<compile_context>
chip_gen: v7x
topology: tpu7x:2x2x1
jax: 0.10.0
libtpu: 0.0.40
codegen_flags: <defaults>
</compile_context>

<pallas_src>
import math
import functools

import jax
import jax.numpy as jnp
from jax.experimental import pallas as pl
from jax.experimental.pallas import tpu as pltpu  # noqa: F401  (TPU backend)

# ----------------------------- config (small) -------------------------------
VOCAB = 64
HIDDEN = 32
N_LAYERS = 2
N_HEADS = 2
HEAD_DIM = HIDDEN // N_HEADS
INTERMEDIATE = 64
MAX_POS = 16
TYPE_VOCAB = 2
LN_EPS = 1e-12
REG_OUT = 3
REG_PAD = 128          # lane-dense regressor output, sliced to 3 in wrapper

BATCH = 2
SEQ = 8


# ----------------------------- in-kernel helpers ----------------------------
def _layernorm(x, g, b):
    mean = jnp.mean(x, axis=-1, keepdims=True)
    var = jnp.mean(jnp.square(x - mean), axis=-1, keepdims=True)
    return (x - mean) * jax.lax.rsqrt(var + LN_EPS) * g + b


def _gelu(y):
    # TODO(synk): HF BERT default is exact erf-GELU; tanh approximation used
    # here for robust TPU Mosaic lowering (numerically near-identical).
    return 0.5 * y * (1.0 + jnp.tanh(0.7978845608028654 * (y + 0.044715 * y * y * y)))


def _softmax_rows(s):
    s = s - jnp.max(s, axis=-1, keepdims=True)
    p = jnp.exp(s)
    return p * pl.reciprocal(jnp.sum(p, axis=-1, keepdims=True), approx=True)


# ----------------------------- fused model kernel ---------------------------
def _model_kernel(h_ref, mask_ref,
                  emb_g_ref, emb_b_ref,
                  wqkv_ref, bqkv_ref, wo_ref, bo_ref, ln1g_ref, ln1b_ref,
                  wi_ref, bi_ref, wo2_ref, bo2_ref, ln2g_ref, ln2b_ref,
                  pool_w_ref, pool_b_ref, reg_w_ref, reg_b_ref,
                  out_ref, *, batch, seq):
    H, dh, nH = HIDDEN, HEAD_DIM, N_HEADS
    scale = 1.0 / math.sqrt(dh)

    # embedding layernorm
    x = _layernorm(h_ref[...], emb_g_ref[...], emb_b_ref[...])       # (B*S, H)
    mask = mask_ref[...]                                             # (B, S) additive

    for l in range(N_LAYERS):
        # ---- fused QKV projection: (B*S, H) @ (H, 3H) -----------------------
        qkv = jnp.dot(x, wqkv_ref[l], preferred_element_type=jnp.float32) + bqkv_ref[l]
        q = qkv[:, 0:H]
        k = qkv[:, H:2 * H]
        v = qkv[:, 2 * H:3 * H]

        # ---- attention: all (batch, head) pairs in-kernel, static slices ----
        ctx_rows = []
        for b in range(batch):
            r0, r1 = b * seq, (b + 1) * seq
            mask_b = mask[b:b + 1, :]                                 # (1, S)
            head_ctx = []
            for h in range(nH):
                c0, c1 = h * dh, (h + 1) * dh
                q_bh = q[r0:r1, c0:c1]                                # (S, dh)
                k_bh = k[r0:r1, c0:c1]
                v_bh = v[r0:r1, c0:c1]
                s = jnp.dot(q_bh, k_bh.T,
                            preferred_element_type=jnp.float32) * scale + mask_b
                p = _softmax_rows(s)                                  # (S, S)
                head_ctx.append(jnp.dot(p, v_bh,
                                        preferred_element_type=jnp.float32))
            ctx_rows.append(jnp.concatenate(head_ctx, axis=1))        # (S, H)
        ctx = jnp.concatenate(ctx_rows, axis=0)                       # (B*S, H)

        # ---- attention output projection + post-LN residual -----------------
        attn_out = jnp.dot(ctx, wo_ref[l], preferred_element_type=jnp.float32) + bo_ref[l]
        h1 = _layernorm(attn_out + x, ln1g_ref[l], ln1b_ref[l])

        # ---- FFN (GELU) + post-LN residual ----------------------------------
        inter = _gelu(jnp.dot(h1, wi_ref[l], preferred_element_type=jnp.float32) + bi_ref[l])
        ffn_out = jnp.dot(inter, wo2_ref[l], preferred_element_type=jnp.float32) + bo2_ref[l]
        x = _layernorm(ffn_out + h1, ln2g_ref[l], ln2b_ref[l])

    # ---- pooler on [CLS] rows, then lane-dense (128-wide) regressor ---------
    cls = jnp.concatenate([x[b * seq:b * seq + 1, :] for b in range(batch)], axis=0)
    pooled = jnp.tanh(jnp.dot(cls, pool_w_ref[...],
                              preferred_element_type=jnp.float32) + pool_b_ref[...])
    out_ref[...] = (jnp.dot(pooled, reg_w_ref[...],
                            preferred_element_type=jnp.float32) + reg_b_ref[...])


# ----------------------------- parameter init -------------------------------
def init_params(key):
    def nrm(key, shape):
        return 0.02 * jax.random.normal(key, shape, dtype=jnp.float32)

    keys = iter(jax.random.split(key, 64))
    L, H, I = N_LAYERS, HIDDEN, INTERMEDIATE
    p = {
        "word_emb": nrm(next(keys), (VOCAB, H)),
        "pos_emb": nrm(next(keys), (MAX_POS, H)),
        "type_emb": nrm(next(keys), (TYPE_VOCAB, H)),
        "emb_ln_g": jnp.ones((1, H), jnp.float32),
        "emb_ln_b": jnp.zeros((1, H), jnp.float32),
        # per-layer weights stacked along a leading layer axis; Q|K|V fused.
        "wqkv": nrm(next(keys), (L, H, 3 * H)),
        "bqkv": jnp.zeros((L, 1, 3 * H), jnp.float32),
        "wo":   nrm(next(keys), (L, H, H)),
        "bo":   jnp.zeros((L, 1, H), jnp.float32),
        "ln1_g": jnp.ones((L, 1, H), jnp.float32),
        "ln1_b": jnp.zeros((L, 1, H), jnp.float32),
        "wi":   nrm(next(keys), (L, H, I)),
        "bi":   jnp.zeros((L, 1, I), jnp.float32),
        "wo2":  nrm(next(keys), (L, I, H)),
        "bo2":  jnp.zeros((L, 1, H), jnp.float32),
        "ln2_g": jnp.ones((L, 1, H), jnp.float32),
        "ln2_b": jnp.zeros((L, 1, H), jnp.float32),
        "pool_w": nrm(next(keys), (H, H)),
        "pool_b": jnp.zeros((1, H), jnp.float32),
    }
    reg_w = nrm(next(keys), (H, REG_OUT))
    reg_b = jnp.zeros((REG_OUT,), jnp.float32)
    # pad regressor to 128 output lanes (zero columns beyond 3) -> lane-dense store
    p["reg_w_pad"] = jnp.pad(reg_w, ((0, 0), (0, REG_PAD - REG_OUT)))
    p["reg_b_pad"] = jnp.pad(reg_b, (0, REG_PAD - REG_OUT)).reshape(1, REG_PAD)
    return p


# ----------------------------- forward pass ---------------------------------
def color_predictor_forward(params, input_ids, attention_mask, token_type_ids):
    B, S = input_ids.shape
    positions = jnp.arange(S, dtype=jnp.int32)

    # embeddings (gather is plain-JAX glue)
    h = (params["word_emb"][input_ids]
         + params["pos_emb"][positions][None, :, :]
         + params["type_emb"][token_type_ids]).reshape(B * S, HIDDEN)

    # additive attention mask: 0 where attended, -1e9 where padded
    add_mask = (1.0 - attention_mask.astype(jnp.float32)) * -1e9      # (B, S)

    kern = functools.partial(_model_kernel, batch=B, seq=S)
    hsv_pad = pl.pallas_call(
        kern,
        out_shape=jax.ShapeDtypeStruct((B, REG_PAD), jnp.float32),
    )(h, add_mask,
      params["emb_ln_g"], params["emb_ln_b"],
      params["wqkv"], params["bqkv"], params["wo"], params["bo"],
      params["ln1_g"], params["ln1_b"],
      params["wi"], params["bi"], params["wo2"], params["bo2"],
      params["ln2_g"], params["ln2_b"],
      params["pool_w"], params["pool_b"],
      params["reg_w_pad"], params["reg_b_pad"])

    return hsv_pad[:, :REG_OUT]


# ----------------------------- main ------------------------------------------
if __name__ == "__main__":
    key = jax.random.PRNGKey(0)
    pkey, ikey = jax.random.split(key)

    params = init_params(pkey)

    input_ids = jax.random.randint(ikey, (BATCH, SEQ), 0, VOCAB, dtype=jnp.int32)
    attention_mask = jnp.array(
        [[1, 1, 1, 1, 1, 1, 1, 1],
         [1, 1, 1, 1, 1, 0, 0, 0]], dtype=jnp.int32)
    token_type_ids = jnp.zeros((BATCH, SEQ), dtype=jnp.int32)

    fwd = jax.jit(color_predictor_forward)
    hsv_values = fwd(params, input_ids, attention_mask, token_type_ids)
    hsv_values = jax.block_until_ready(hsv_values)

    assert hsv_values.shape == (BATCH, 3)
    assert hsv_values.dtype == jnp.float32
    print("KERNEL_OK")
</pallas_src>

<mosaic_0001>
module attributes {stable_mosaic.version = 11 : i64} {
  func.func @_model_kernel(%arg0: memref<16x32xf32, #tpu.memory_space<vmem>>, %arg1: memref<2x8xf32, #tpu.memory_space<vmem>>, %arg2: memref<1x32xf32, #tpu.memory_space<vmem>>, %arg3: memref<1x32xf32, #tpu.memory_space<vmem>>, %arg4: memref<2x32x96xf32, #tpu.memory_space<vmem>>, %arg5: memref<2x1x96xf32, #tpu.memory_space<vmem>>, %arg6: memref<2x32x32xf32, #tpu.memory_space<vmem>>, %arg7: memref<2x1x32xf32, #tpu.memory_space<vmem>>, %arg8: memref<2x1x32xf32, #tpu.memory_space<vmem>>, %arg9: memref<2x1x32xf32, #tpu.memory_space<vmem>>, %arg10: memref<2x32x64xf32, #tpu.memory_space<vmem>>, %arg11: memref<2x1x64xf32, #tpu.memory_space<vmem>>, %arg12: memref<2x64x32xf32, #tpu.memory_space<vmem>>, %arg13: memref<2x1x32xf32, #tpu.memory_space<vmem>>, %arg14: memref<2x1x32xf32, #tpu.memory_space<vmem>>, %arg15: memref<2x1x32xf32, #tpu.memory_space<vmem>>, %arg16: memref<32x32xf32, #tpu.memory_space<vmem>>, %arg17: memref<1x32xf32, #tpu.memory_space<vmem>>, %arg18: memref<32x128xf32, #tpu.memory_space<vmem>>, %arg19: memref<1x128xf32, #tpu.memory_space<vmem>>, %arg20: memref<2x128xf32, #tpu.memory_space<vmem>>) attributes {dimension_semantics = [], scalar_prefetch = 0 : i64, scratch_operands = 0 : i64, tpu.core_type = #tpu.core_type<tc>} {
    %c0 = arith.constant 0 : index
    %c0_0 = arith.constant 0 : index
    %0 = vector.load %arg0[%c0, %c0_0] : memref<16x32xf32, #tpu.memory_space<vmem>>, vector<16x32xf32>
    %c0_1 = arith.constant 0 : index
    %c0_2 = arith.constant 0 : index
    %1 = vector.load %arg2[%c0_1, %c0_2] : memref<1x32xf32, #tpu.memory_space<vmem>>, vector<1x32xf32>
    %c0_3 = arith.constant 0 : index
    %c0_4 = arith.constant 0 : index
    %2 = vector.load %arg3[%c0_3, %c0_4] : memref<1x32xf32, #tpu.memory_space<vmem>>, vector<1x32xf32>
    %cst = arith.constant dense<0.000000e+00> : vector<16xf32>
    %3 = vector.multi_reduction <add>, %0, %cst [1] : vector<16x32xf32> to vector<16xf32>
    %4 = vector.shape_cast %3 : vector<16xf32> to vector<16x1xf32>
    %cst_5 = arith.constant 3.200000e+01 : f32
    %5 = vector.broadcast %cst_5 : f32 to vector<16x1xf32>
    %6 = arith.divf %4, %5 : vector<16x1xf32>
    %7 = vector.broadcast %6 : vector<16x1xf32> to vector<16x32xf32>
    %8 = arith.subf %0, %7 : vector<16x32xf32>
    %9 = arith.mulf %8, %8 : vector<16x32xf32>
    %cst_6 = arith.constant dense<0.000000e+00> : vector<16xf32>
    %10 = vector.multi_reduction <add>, %9, %cst_6 [1] : vector<16x32xf32> to vector<16xf32>
    %11 = vector.shape_cast %10 : vector<16xf32> to vector<16x1xf32>
    %cst_7 = arith.constant 3.200000e+01 : f32
    %12 = vector.broadcast %cst_7 : f32 to vector<16x1xf32>
    %13 = arith.divf %11, %12 : vector<16x1xf32>
    %14 = vector.broadcast %6 : vector<16x1xf32> to vector<16x32xf32>
    %15 = arith.subf %0, %14 : vector<16x32xf32>
    %cst_8 = arith.constant 9.99999996E-13 : f32
    %16 = vector.broadcast %cst_8 : f32 to vector<16x1xf32>
    %17 = arith.addf %13, %16 : vector<16x1xf32>
    %18 = math.rsqrt %17 : vector<16x1xf32>
    %19 = vector.broadcast %18 : vector<16x1xf32> to vector<16x32xf32>
    %20 = arith.mulf %15, %19 : vector<16x32xf32>
    %21 = vector.broadcast %1 : vector<1x32xf32> to vector<16x32xf32>
    %22 = arith.mulf %20, %21 : vector<16x32xf32>
    %23 = vector.broadcast %2 : vector<1x32xf32> to vector<16x32xf32>
    %24 = arith.addf %22, %23 : vector<16x32xf32>
    %c0_9 = arith.constant 0 : index
    %c0_10 = arith.constant 0 : index
    %25 = vector.load %arg1[%c0_9, %c0_10] : memref<2x8xf32, #tpu.memory_space<vmem>>, vector<2x8xf32>
    %c0_11 = arith.constant 0 : index
    %c0_12 = arith.constant 0 : index
    %c0_13 = arith.constant 0 : index
    %26 = vector.load %arg4[%c0_11, %c0_12, %c0_13] : memref<2x32x96xf32, #tpu.memory_space<vmem>>, vector<1x32x96xf32>
    %27 = vector.shape_cast %26 : vector<1x32x96xf32> to vector<32x96xf32>
    %cst_14 = arith.constant dense<0.000000e+00> : vector<16x96xf32>
    %28 = tpu.matmul %24, %27, %cst_14 {dimension_numbers = #tpu.dot_dimension_numbers<[1], [0], [0], [1], [0, 0, 1, 1], [], []>} : vector<16x32xf32>, vector<32x96xf32>, vector<16x96xf32> -> vector<16x96xf32>
    %c0_15 = arith.constant 0 : index
    %c0_16 = arith.constant 0 : index
    %c0_17 = arith.constant 0 : index
    %29 = vector.load %arg5[%c0_15, %c0_16, %c0_17] : memref<2x1x96xf32, #tpu.memory_space<vmem>>, vector<1x1x96xf32>
    %30 = vector.shape_cast %29 : vector<1x1x96xf32> to vector<1x96xf32>
    %31 = vector.broadcast %30 : vector<1x96xf32> to vector<16x96xf32>
    %32 = arith.addf %28, %31 : vector<16x96xf32>
    %33 = vector.extract_strided_slice %32 {offsets = [0, 0], sizes = [16, 32], strides = [1, 1]} : vector<16x96xf32> to vector<16x32xf32>
    %34 = vector.extract_strided_slice %32 {offsets = [0, 32], sizes = [16, 32], strides = [1, 1]} : vector<16x96xf32> to vector<16x32xf32>
    %35 = vector.extract_strided_slice %32 {offsets = [0, 64], sizes = [16, 32], strides = [1, 1]} : vector<16x96xf32> to vector<16x32xf32>
    %36 = vector.extract_strided_slice %25 {offsets = [0, 0], sizes = [1, 8], strides = [1, 1]} : vector<2x8xf32> to vector<1x8xf32>
    %37 = vector.extract_strided_slice %33 {offsets = [0, 0], sizes = [8, 16], strides = [1, 1]} : vector<16x32xf32> to vector<8x16xf32>
    %38 = vector.extract_strided_slice %34 {offsets = [0, 0], sizes = [8, 16], strides = [1, 1]} : vector<16x32xf32> to vector<8x16xf32>
    %39 = vector.extract_strided_slice %35 {offsets = [0, 0], sizes = [8, 16], strides = [1, 1]} : vector<16x32xf32> to vector<8x16xf32>
    %40 = tpu.transpose %38, [1, 0] : vector<8x16xf32> -> vector<16x8xf32>
    %cst_18 = arith.constant dense<0.000000e+00> : vector<8x8xf32>
    %41 = tpu.matmul %37, %40, %cst_18 {dimension_numbers = #tpu.dot_dimension_numbers<[1], [0], [0], [1], [0, 0, 1, 1], [], []>} : vector<8x16xf32>, vector<16x8xf32>, vector<8x8xf32> -> vector<8x8xf32>
    %cst_19 = arith.constant 2.500000e-01 : f32
    %42 = vector.broadcast %cst_19 : f32 to vector<8x8xf32>
    %43 = arith.mulf %41, %42 : vector<8x8xf32>
    %44 = vector.broadcast %36 : vector<1x8xf32> to vector<8x8xf32>
    %45 = arith.addf %43, %44 : vector<8x8xf32>
    %cst_20 = arith.constant dense<0xFF800000> : vector<8xf32>
    %46 = vector.multi_reduction <maximumf>, %45, %cst_20 [1] : vector<8x8xf32> to vector<8xf32>
    %47 = vector.shape_cast %46 : vector<8xf32> to vector<8x1xf32>
    %48 = vector.broadcast %47 : vector<8x1xf32> to vector<8x8xf32>
    %49 = arith.subf %45, %48 : vector<8x8xf32>
    %50 = math.exp %49 : vector<8x8xf32>
    %cst_21 = arith.constant dense<0.000000e+00> : vector<8xf32>
    %51 = vector.multi_reduction <add>, %50, %cst_21 [1] : vector<8x8xf32> to vector<8xf32>
    %52 = vector.shape_cast %51 : vector<8xf32> to vector<8x1xf32>
    %53 = tpu.reciprocal %52 {approx = true} : vector<8x1xf32> -> vector<8x1xf32>
    %54 = vector.broadcast %53 : vector<8x1xf32> to vector<8x8xf32>
    %55 = arith.mulf %50, %54 : vector<8x8xf32>
    %cst_22 = arith.constant dense<0.000000e+00> : vector<8x16xf32>
    %56 = tpu.matmul %55, %39, %cst_22 {dimension_numbers = #tpu.dot_dimension_numbers<[1], [0], [0], [1], [0, 0, 1, 1], [], []>} : vector<8x8xf32>, vector<8x16xf32>, vector<8x16xf32> -> vector<8x16xf32>
    %57 = vector.extract_strided_slice %33 {offsets = [0, 16], sizes = [8, 16], strides = [1, 1]} : vector<16x32xf32> to vector<8x16xf32>
    %58 = vector.extract_strided_slice %34 {offsets = [0, 16], sizes = [8, 16], strides = [1, 1]} : vector<16x32xf32> to vector<8x16xf32>
    %59 = vector.extract_strided_slice %35 {offsets = [0, 16], sizes = [8, 16], strides = [1, 1]} : vector<16x32xf32> to vector<8x16xf32>
    %60 = tpu.transpose %58, [1, 0] : vector<8x16xf32> -> vector<16x8xf32>
    %cst_23 = arith.constant dense<0.000000e+00> : vector<8x8xf32>
    %61 = tpu.matmul %57, %60, %cst_23 {dimension_numbers = #tpu.dot_dimension_numbers<[1], [0], [0], [1], [0, 0, 1, 1], [], []>} : vector<8x16xf32>, vector<16x8xf32>, vector<8x8xf32> -> vector<8x8xf32>
    %cst_24 = arith.constant 2.500000e-01 : f32
    %62 = vector.broadcast %cst_24 : f32 to vector<8x8xf32>
    %63 = arith.mulf %61, %62 : vector<8x8xf32>
    %64 = vector.broadcast %36 : vector<1x8xf32> to vector<8x8xf32>
    %65 = arith.addf %63, %64 : vector<8x8xf32>
    %cst_25 = arith.constant dense<0xFF800000> : vector<8xf32>
    %66 = vector.multi_reduction <maximumf>, %65, %cst_25 [1] : vector<8x8xf32> to vector<8xf32>
    %67 = vector.shape_cast %66 : vector<8xf32> to vector<8x1xf32>
    %68 = vector.broadcast %67 : vector<8x1xf32> to vector<8x8xf32>
    %69 = arith.subf %65, %68 : vector<8x8xf32>
    %70 = math.exp %69 : vector<8x8xf32>
    %cst_26 = arith.constant dense<0.000000e+00> : vector<8xf32>
    %71 = vector.multi_reduction <add>, %70, %cst_26 [1] : vector<8x8xf32> to vector<8xf32>
    %72 = vector.shape_cast %71 : vector<8xf32> to vector<8x1xf32>
    %73 = tpu.reciprocal %72 {approx = true} : vector<8x1xf32> -> vector<8x1xf32>
    %74 = vector.broadcast %73 : vector<8x1xf32> to vector<8x8xf32>
    %75 = arith.mulf %70, %74 : vector<8x8xf32>
    %cst_27 = arith.constant dense<0.000000e+00> : vector<8x16xf32>
    %76 = tpu.matmul %75, %59, %cst_27 {dimension_numbers = #tpu.dot_dimension_numbers<[1], [0], [0], [1], [0, 0, 1, 1], [], []>} : vector<8x8xf32>, vector<8x16xf32>, vector<8x16xf32> -> vector<8x16xf32>
    %77 = tpu.concatenate %56, %76 in 1 : vector<8x16xf32>, vector<8x16xf32> -> vector<8x32xf32>
    %78 = vector.extract_strided_slice %25 {offsets = [1, 0], sizes = [1, 8], strides = [1, 1]} : vector<2x8xf32> to vector<1x8xf32>
    %79 = vector.extract_strided_slice %33 {offsets = [8, 0], sizes = [8, 16], strides = [1, 1]} : vector<16x32xf32> to vector<8x16xf32>
    %80 = vector.extract_strided_slice %34 {offsets = [8, 0], sizes = [8, 16], strides = [1, 1]} : vector<16x32xf32> to vector<8x16xf32>
    %81 = vector.extract_strided_slice %35 {offsets = [8, 0], sizes = [8, 16], strides = [1, 1]} : vector<16x32xf32> to vector<8x16xf32>
    %82 = tpu.transpose %80, [1, 0] : vector<8x16xf32> -> vector<16x8xf32>
    %cst_28 = arith.constant dense<0.000000e+00> : vector<8x8xf32>
    %83 = tpu.matmul %79, %82, %cst_28 {dimension_numbers = #tpu.dot_dimension_numbers<[1], [0], [0], [1], [0, 0, 1, 1], [], []>} : vector<8x16xf32>, vector<16x8xf32>, vector<8x8xf32> -> vector<8x8xf32>
    %cst_29 = arith.constant 2.500000e-01 : f32
    %84 = vector.broadcast %cst_29 : f32 to vector<8x8xf32>
    %85 = arith.mulf %83, %84 : vector<8x8xf32>
    %86 = vector.broadcast %78 : vector<1x8xf32> to vector<8x8xf32>
    %87 = arith.addf %85, %86 : vector<8x8xf32>
    %cst_30 = arith.constant dense<0xFF800000> : vector<8xf32>
    %88 = vector.multi_reduction <maximumf>, %87, %cst_30 [1] : vector<8x8xf32> to vector<8xf32>
    %89 = vector.shape_cast %88 : vector<8xf32> to vector<8x1xf32>
    %90 = vector.broadcast %89 : vector<8x1xf32> to vector<8x8xf32>
    %91 = arith.subf %87, %90 : vector<8x8xf32>
    %92 = math.exp %91 : vector<8x8xf32>
    %cst_31 = arith.constant dense<0.000000e+00> : vector<8xf32>
    %93 = vector.multi_reduction <add>, %92, %cst_31 [1] : vector<8x8xf32> to vector<8xf32>
    %94 = vector.shape_cast %93 : vector<8xf32> to vector<8x1xf32>
    %95 = tpu.reciprocal %94 {approx = true} : vector<8x1xf32> -> vector<8x1xf32>
    %96 = vector.broadcast %95 : vector<8x1xf32> to vector<8x8xf32>
    %97 = arith.mulf %92, %96 : vector<8x8xf32>
    %cst_32 = arith.constant dense<0.000000e+00> : vector<8x16xf32>
    %98 = tpu.matmul %97, %81, %cst_32 {dimension_numbers = #tpu.dot_dimension_numbers<[1], [0], [0], [1], [0, 0, 1, 1], [], []>} : vector<8x8xf32>, vector<8x16xf32>, vector<8x16xf32> -> vector<8x16xf32>
    %99 = vector.extract_strided_slice %33 {offsets = [8, 16], sizes = [8, 16], strides = [1, 1]} : vector<16x32xf32> to vector<8x16xf32>
    %100 = vector.extract_strided_slice %34 {offsets = [8, 16], sizes = [8, 16], strides = [1, 1]} : vector<16x32xf32> to vector<8x16xf32>
    %101 = vector.extract_strided_slice %35 {offsets = [8, 16], sizes = [8, 16], strides = [1, 1]} : vector<16x32xf32> to vector<8x16xf32>
    %102 = tpu.transpose %100, [1, 0] : vector<8x16xf32> -> vector<16x8xf32>
    %cst_33 = arith.constant dense<0.000000e+00> : vector<8x8xf32>
    %103 = tpu.matmul %99, %102, %cst_33 {dimension_numbers = #tpu.dot_dimension_numbers<[1], [0], [0], [1], [0, 0, 1, 1], [], []>} : vector<8x16xf32>, vector<16x8xf32>, vector<8x8xf32> -> vector<8x8xf32>
    %cst_34 = arith.constant 2.500000e-01 : f32
    %104 = vector.broadcast %cst_34 : f32 to vector<8x8xf32>
    %105 = arith.mulf %103, %104 : vector<8x8xf32>
    %106 = vector.broadcast %78 : vector<1x8xf32> to vector<8x8xf32>
    %107 = arith.addf %105, %106 : vector<8x8xf32>
    %cst_35 = arith.constant dense<0xFF800000> : vector<8xf32>
    %108 = vector.multi_reduction <maximumf>, %107, %cst_35 [1] : vector<8x8xf32> to vector<8xf32>
    %109 = vector.shape_cast %108 : vector<8xf32> to vector<8x1xf32>
    %110 = vector.broadcast %109 : vector<8x1xf32> to vector<8x8xf32>
    %111 = arith.subf %107, %110 : vector<8x8xf32>
    %112 = math.exp %111 : vector<8x8xf32>
    %cst_36 = arith.constant dense<0.000000e+00> : vector<8xf32>
    %113 = vector.multi_reduction <add>, %112, %cst_36 [1] : vector<8x8xf32> to vector<8xf32>
    %114 = vector.shape_cast %113 : vector<8xf32> to vector<8x1xf32>
    %115 = tpu.reciprocal %114 {approx = true} : vector<8x1xf32> -> vector<8x1xf32>
    %116 = vector.broadcast %115 : vector<8x1xf32> to vector<8x8xf32>
    %117 = arith.mulf %112, %116 : vector<8x8xf32>
    %cst_37 = arith.constant dense<0.000000e+00> : vector<8x16xf32>
    %118 = tpu.matmul %117, %101, %cst_37 {dimension_numbers = #tpu.dot_dimension_numbers<[1], [0], [0], [1], [0, 0, 1, 1], [], []>} : vector<8x8xf32>, vector<8x16xf32>, vector<8x16xf32> -> vector<8x16xf32>
    %119 = tpu.concatenate %98, %118 in 1 : vector<8x16xf32>, vector<8x16xf32> -> vector<8x32xf32>
    %120 = tpu.concatenate %77, %119 in 0 : vector<8x32xf32>, vector<8x32xf32> -> vector<16x32xf32>
    %c0_38 = arith.constant 0 : index
    %c0_39 = arith.constant 0 : index
    %c0_40 = arith.constant 0 : index
    %121 = vector.load %arg6[%c0_38, %c0_39, %c0_40] : memref<2x32x32xf32, #tpu.memory_space<vmem>>, vector<1x32x32xf32>
    %122 = vector.shape_cast %121 : vector<1x32x32xf32> to vector<32x32xf32>
    %cst_41 = arith.constant dense<0.000000e+00> : vector<16x32xf32>
    %123 = tpu.matmul %120, %122, %cst_41 {dimension_numbers = #tpu.dot_dimension_numbers<[1], [0], [0], [1], [0, 0, 1, 1], [], []>} : vector<16x32xf32>, vector<32x32xf32>, vector<16x32xf32> -> vector<16x32xf32>
    %c0_42 = arith.constant 0 : index
    %c0_43 = arith.constant 0 : index
    %c0_44 = arith.constant 0 : index
    %124 = vector.load %arg7[%c0_42, %c0_43, %c0_44] : memref<2x1x32xf32, #tpu.memory_space<vmem>>, vector<1x1x32xf32>
    %125 = vector.shape_cast %124 : vector<1x1x32xf32> to vector<1x32xf32>
    %126 = vector.broadcast %125 : vector<1x32xf32> to vector<16x32xf32>
    %127 = arith.addf %123, %126 : vector<16x32xf32>
    %128 = arith.addf %127, %24 : vector<16x32xf32>
    %c0_45 = arith.constant 0 : index
    %c0_46 = arith.constant 0 : index
    %c0_47 = arith.constant 0 : index
    %129 = vector.load %arg8[%c0_45, %c0_46, %c0_47] : memref<2x1x32xf32, #tpu.memory_space<vmem>>, vector<1x1x32xf32>
    %130 = vector.shape_cast %129 : vector<1x1x32xf32> to vector<1x32xf32>
    %c0_48 = arith.constant 0 : index
    %c0_49 = arith.constant 0 : index
    %c0_50 = arith.constant 0 : index
    %131 = vector.load %arg9[%c0_48, %c0_49, %c0_50] : memref<2x1x32xf32, #tpu.memory_space<vmem>>, vector<1x1x32xf32>
    %132 = vector.shape_cast %131 : vector<1x1x32xf32> to vector<1x32xf32>
    %cst_51 = arith.constant dense<0.000000e+00> : vector<16xf32>
    %133 = vector.multi_reduction <add>, %128, %cst_51 [1] : vector<16x32xf32> to vector<16xf32>
    %134 = vector.shape_cast %133 : vector<16xf32> to vector<16x1xf32>
    %cst_52 = arith.constant 3.200000e+01 : f32
    %135 = vector.broadcast %cst_52 : f32 to vector<16x1xf32>
    %136 = arith.divf %134, %135 : vector<16x1xf32>
    %137 = vector.broadcast %136 : vector<16x1xf32> to vector<16x32xf32>
    %138 = arith.subf %128, %137 : vector<16x32xf32>
    %139 = arith.mulf %138, %138 : vector<16x32xf32>
    %cst_53 = arith.constant dense<0.000000e+00> : vector<16xf32>
    %140 = vector.multi_reduction <add>, %139, %cst_53 [1] : vector<16x32xf32> to vector<16xf32>
    %141 = vector.shape_cast %140 : vector<16xf32> to vector<16x1xf32>
    %cst_54 = arith.constant 3.200000e+01 : f32
    %142 = vector.broadcast %cst_54 : f32 to vector<16x1xf32>
    %143 = arith.divf %141, %142 : vector<16x1xf32>
    %144 = vector.broadcast %136 : vector<16x1xf32> to vector<16x32xf32>
    %145 = arith.subf %128, %144 : vector<16x32xf32>
    %cst_55 = arith.constant 9.99999996E-13 : f32
    %146 = vector.broadcast %cst_55 : f32 to vector<16x1xf32>
    %147 = arith.addf %143, %146 : vector<16x1xf32>
    %148 = math.rsqrt %147 : vector<16x1xf32>
    %149 = vector.broadcast %148 : vector<16x1xf32> to vector<16x32xf32>
    %150 = arith.mulf %145, %149 : vector<16x32xf32>
    %151 = vector.broadcast %130 : vector<1x32xf32> to vector<16x32xf32>
    %152 = arith.mulf %150, %151 : vector<16x32xf32>
    %153 = vector.broadcast %132 : vector<1x32xf32> to vector<16x32xf32>
    %154 = arith.addf %152, %153 : vector<16x32xf32>
    %c0_56 = arith.constant 0 : index
    %c0_57 = arith.constant 0 : index
    %c0_58 = arith.constant 0 : index
    %155 = vector.load %arg10[%c0_56, %c0_57, %c0_58] : memref<2x32x64xf32, #tpu.memory_space<vmem>>, vector<1x32x64xf32>
    %156 = vector.shape_cast %155 : vector<1x32x64xf32> to vector<32x64xf32>
    %cst_59 = arith.constant dense<0.000000e+00> : vector<16x64xf32>
    %157 = tpu.matmul %154, %156, %cst_59 {dimension_numbers = #tpu.dot_dimension_numbers<[1], [0], [0], [1], [0, 0, 1, 1], [], []>} : vector<16x32xf32>, vector<32x64xf32>, vector<16x64xf32> -> vector<16x64xf32>
    %c0_60 = arith.constant 0 : index
    %c0_61 = arith.constant 0 : index
    %c0_62 = arith.constant 0 : index
    %158 = vector.load %arg11[%c0_60, %c0_61, %c0_62] : memref<2x1x64xf32, #tpu.memory_space<vmem>>, vector<1x1x64xf32>
    %159 = vector.shape_cast %158 : vector<1x1x64xf32> to vector<1x64xf32>
    %160 = vector.broadcast %159 : vector<1x64xf32> to vector<16x64xf32>
    %161 = arith.addf %157, %160 : vector<16x64xf32>
    %cst_63 = arith.constant 5.000000e-01 : f32
    %162 = vector.broadcast %cst_63 : f32 to vector<16x64xf32>
    %163 = arith.mulf %162, %161 : vector<16x64xf32>
    %cst_64 = arith.constant 4.471500e-02 : f32
    %164 = vector.broadcast %cst_64 : f32 to vector<16x64xf32>
    %165 = arith.mulf %164, %161 : vector<16x64xf32>
    %166 = arith.mulf %165, %161 : vector<16x64xf32>
    %167 = arith.mulf %166, %161 : vector<16x64xf32>
    %168 = arith.addf %161, %167 : vector<16x64xf32>
    %cst_65 = arith.constant 0.797884583 : f32
    %169 = vector.broadcast %cst_65 : f32 to vector<16x64xf32>
    %170 = arith.mulf %169, %168 : vector<16x64xf32>
    %171 = math.tanh %170 : vector<16x64xf32>
    %cst_66 = arith.constant 1.000000e+00 : f32
    %172 = vector.broadcast %cst_66 : f32 to vector<16x64xf32>
    %173 = arith.addf %172, %171 : vector<16x64xf32>
    %174 = arith.mulf %163, %173 : vector<16x64xf32>
    %c0_67 = arith.constant 0 : index
    %c0_68 = arith.constant 0 : index
    %c0_69 = arith.constant 0 : index
    %175 = vector.load %arg12[%c0_67, %c0_68, %c0_69] : memref<2x64x32xf32, #tpu.memory_space<vmem>>, vector<1x64x32xf32>
    %176 = vector.shape_cast %175 : vector<1x64x32xf32> to vector<64x32xf32>
    %cst_70 = arith.constant dense<0.000000e+00> : vector<16x32xf32>
    %177 = tpu.matmul %174, %176, %cst_70 {dimension_numbers = #tpu.dot_dimension_numbers<[1], [0], [0], [1], [0, 0, 1, 1], [], []>} : vector<16x64xf32>, vector<64x32xf32>, vector<16x32xf32> -> vector<16x32xf32>
    %c0_71 = arith.constant 0 : index
    %c0_72 = arith.constant 0 : index
    %c0_73 = arith.constant 0 : index
    %178 = vector.load %arg13[%c0_71, %c0_72, %c0_73] : memref<2x1x32xf32, #tpu.memory_space<vmem>>, vector<1x1x32xf32>
    %179 = vector.shape_cast %178 : vector<1x1x32xf32> to vector<1x32xf32>
    %180 = vector.broadcast %179 : vector<1x32xf32> to vector<16x32xf32>
    %181 = arith.addf %177, %180 : vector<16x32xf32>
    %182 = arith.addf %181, %154 : vector<16x32xf32>
    %c0_74 = arith.constant 0 : index
    %c0_75 = arith.constant 0 : index
    %c0_76 = arith.constant 0 : index
    %183 = vector.load %arg14[%c0_74, %c0_75, %c0_76] : memref<2x1x32xf32, #tpu.memory_space<vmem>>, vector<1x1x32xf32>
    %184 = vector.shape_cast %183 : vector<1x1x32xf32> to vector<1x32xf32>
    %c0_77 = arith.constant 0 : index
    %c0_78 = arith.constant 0 : index
    %c0_79 = arith.constant 0 : index
    %185 = vector.load %arg15[%c0_77, %c0_78, %c0_79] : memref<2x1x32xf32, #tpu.memory_space<vmem>>, vector<1x1x32xf32>
    %186 = vector.shape_cast %185 : vector<1x1x32xf32> to vector<1x32xf32>
    %cst_80 = arith.constant dense<0.000000e+00> : vector<16xf32>
    %187 = vector.multi_reduction <add>, %182, %cst_80 [1] : vector<16x32xf32> to vector<16xf32>
    %188 = vector.shape_cast %187 : vector<16xf32> to vector<16x1xf32>
    %cst_81 = arith.constant 3.200000e+01 : f32
    %189 = vector.broadcast %cst_81 : f32 to vector<16x1xf32>
    %190 = arith.divf %188, %189 : vector<16x1xf32>
    %191 = vector.broadcast %190 : vector<16x1xf32> to vector<16x32xf32>
    %192 = arith.subf %182, %191 : vector<16x32xf32>
    %193 = arith.mulf %192, %192 : vector<16x32xf32>
    %cst_82 = arith.constant dense<0.000000e+00> : vector<16xf32>
    %194 = vector.multi_reduction <add>, %193, %cst_82 [1] : vector<16x32xf32> to vector<16xf32>
    %195 = vector.shape_cast %194 : vector<16xf32> to vector<16x1xf32>
    %cst_83 = arith.constant 3.200000e+01 : f32
    %196 = vector.broadcast %cst_83 : f32 to vector<16x1xf32>
    %197 = arith.divf %195, %196 : vector<16x1xf32>
    %198 = vector.broadcast %190 : vector<16x1xf32> to vector<16x32xf32>
    %199 = arith.subf %182, %198 : vector<16x32xf32>
    %cst_84 = arith.constant 9.99999996E-13 : f32
    %200 = vector.broadcast %cst_84 : f32 to vector<16x1xf32>
    %201 = arith.addf %197, %200 : vector<16x1xf32>
    %202 = math.rsqrt %201 : vector<16x1xf32>
    %203 = vector.broadcast %202 : vector<16x1xf32> to vector<16x32xf32>
    %204 = arith.mulf %199, %203 : vector<16x32xf32>
    %205 = vector.broadcast %184 : vector<1x32xf32> to vector<16x32xf32>
    %206 = arith.mulf %204, %205 : vector<16x32xf32>
    %207 = vector.broadcast %186 : vector<1x32xf32> to vector<16x32xf32>
    %208 = arith.addf %206, %207 : vector<16x32xf32>
    %c1 = arith.constant 1 : index
    %c0_85 = arith.constant 0 : index
    %c0_86 = arith.constant 0 : index
    %209 = vector.load %arg4[%c1, %c0_85, %c0_86] : memref<2x32x96xf32, #tpu.memory_space<vmem>>, vector<1x32x96xf32>
    %210 = vector.shape_cast %209 : vector<1x32x96xf32> to vector<32x96xf32>
    %cst_87 = arith.constant dense<0.000000e+00> : vector<16x96xf32>
    %211 = tpu.matmul %208, %210, %cst_87 {dimension_numbers = #tpu.dot_dimension_numbers<[1], [0], [0], [1], [0, 0, 1, 1], [], []>} : vector<16x32xf32>, vector<32x96xf32>, vector<16x96xf32> -> vector<16x96xf32>
    %c1_88 = arith.constant 1 : index
    %c0_89 = arith.constant 0 : index
    %c0_90 = arith.constant 0 : index
    %212 = vector.load %arg5[%c1_88, %c0_89, %c0_90] : memref<2x1x96xf32, #tpu.memory_space<vmem>>, vector<1x1x96xf32>
    %213 = vector.shape_cast %212 : vector<1x1x96xf32> to vector<1x96xf32>
    %214 = vector.broadcast %213 : vector<1x96xf32> to vector<16x96xf32>
    %215 = arith.addf %211, %214 : vector<16x96xf32>
    %216 = vector.extract_strided_slice %215 {offsets = [0, 0], sizes = [16, 32], strides = [1, 1]} : vector<16x96xf32> to vector<16x32xf32>
    %217 = vector.extract_strided_slice %215 {offsets = [0, 32], sizes = [16, 32], strides = [1, 1]} : vector<16x96xf32> to vector<16x32xf32>
    %218 = vector.extract_strided_slice %215 {offsets = [0, 64], sizes = [16, 32], strides = [1, 1]} : vector<16x96xf32> to vector<16x32xf32>
    %219 = vector.extract_strided_slice %25 {offsets = [0, 0], sizes = [1, 8], strides = [1, 1]} : vector<2x8xf32> to vector<1x8xf32>
    %220 = vector.extract_strided_slice %216 {offsets = [0, 0], sizes = [8, 16], strides = [1, 1]} : vector<16x32xf32> to vector<8x16xf32>
    %221 = vector.extract_strided_slice %217 {offsets = [0, 0], sizes = [8, 16], strides = [1, 1]} : vector<16x32xf32> to vector<8x16xf32>
    %222 = vector.extract_strided_slice %218 {offsets = [0, 0], sizes = [8, 16], strides = [1, 1]} : vector<16x32xf32> to vector<8x16xf32>
    %223 = tpu.transpose %221, [1, 0] : vector<8x16xf32> -> vector<16x8xf32>
    %cst_91 = arith.constant dense<0.000000e+00> : vector<8x8xf32>
    %224 = tpu.matmul %220, %223, %cst_91 {dimension_numbers = #tpu.dot_dimension_numbers<[1], [0], [0], [1], [0, 0, 1, 1], [], []>} : vector<8x16xf32>, vector<16x8xf32>, vector<8x8xf32> -> vector<8x8xf32>
    %cst_92 = arith.constant 2.500000e-01 : f32
    %225 = vector.broadcast %cst_92 : f32 to vector<8x8xf32>
    %226 = arith.mulf %224, %225 : vector<8x8xf32>
    %227 = vector.broadcast %219 : vector<1x8xf32> to vector<8x8xf32>
    %228 = arith.addf %226, %227 : vector<8x8xf32>
    %cst_93 = arith.constant dense<0xFF800000> : vector<8xf32>
    %229 = vector.multi_reduction <maximumf>, %228, %cst_93 [1] : vector<8x8xf32> to vector<8xf32>
    %230 = vector.shape_cast %229 : vector<8xf32> to vector<8x1xf32>
    %231 = vector.broadcast %230 : vector<8x1xf32> to vector<8x8xf32>
    %232 = arith.subf %228, %231 : vector<8x8xf32>
    %233 = math.exp %232 : vector<8x8xf32>
    %cst_94 = arith.constant dense<0.000000e+00> : vector<8xf32>
    %234 = vector.multi_reduction <add>, %233, %cst_94 [1] : vector<8x8xf32> to vector<8xf32>
    %235 = vector.shape_cast %234 : vector<8xf32> to vector<8x1xf32>
    %236 = tpu.reciprocal %235 {approx = true} : vector<8x1xf32> -> vector<8x1xf32>
    %237 = vector.broadcast %236 : vector<8x1xf32> to vector<8x8xf32>
    %238 = arith.mulf %233, %237 : vector<8x8xf32>
    %cst_95 = arith.constant dense<0.000000e+00> : vector<8x16xf32>
    %239 = tpu.matmul %238, %222, %cst_95 {dimension_numbers = #tpu.dot_dimension_numbers<[1], [0], [0], [1], [0, 0, 1, 1], [], []>} : vector<8x8xf32>, vector<8x16xf32>, vector<8x16xf32> -> vector<8x16xf32>
    %240 = vector.extract_strided_slice %216 {offsets = [0, 16], sizes = [8, 16], strides = [1, 1]} : vector<16x32xf32> to vector<8x16xf32>
    %241 = vector.extract_strided_slice %217 {offsets = [0, 16], sizes = [8, 16], strides = [1, 1]} : vector<16x32xf32> to vector<8x16xf32>
    %242 = vector.extract_strided_slice %218 {offsets = [0, 16], sizes = [8, 16], strides = [1, 1]} : vector<16x32xf32> to vector<8x16xf32>
    %243 = tpu.transpose %241, [1, 0] : vector<8x16xf32> -> vector<16x8xf32>
    %cst_96 = arith.constant dense<0.000000e+00> : vector<8x8xf32>
    %244 = tpu.matmul %240, %243, %cst_96 {dimension_numbers = #tpu.dot_dimension_numbers<[1], [0], [0], [1], [0, 0, 1, 1], [], []>} : vector<8x16xf32>, vector<16x8xf32>, vector<8x8xf32> -> vector<8x8xf32>
    %cst_97 = arith.constant 2.500000e-01 : f32
    %245 = vector.broadcast %cst_97 : f32 to vector<8x8xf32>
    %246 = arith.mulf %244, %245 : vector<8x8xf32>
    %247 = vector.broadcast %219 : vector<1x8xf32> to vector<8x8xf32>
    %248 = arith.addf %246, %247 : vector<8x8xf32>
    %cst_98 = arith.constant dense<0xFF800000> : vector<8xf32>
    %249 = vector.multi_reduction <maximumf>, %248, %cst_98 [1] : vector<8x8xf32> to vector<8xf32>
    %250 = vector.shape_cast %249 : vector<8xf32> to vector<8x1xf32>
    %251 = vector.broadcast %250 : vector<8x1xf32> to vector<8x8xf32>
    %252 = arith.subf %248, %251 : vector<8x8xf32>
    %253 = math.exp %252 : vector<8x8xf32>
    %cst_99 = arith.constant dense<0.000000e+00> : vector<8xf32>
    %254 = vector.multi_reduction <add>, %253, %cst_99 [1] : vector<8x8xf32> to vector<8xf32>
    %255 = vector.shape_cast %254 : vector<8xf32> to vector<8x1xf32>
    %256 = tpu.reciprocal %255 {approx = true} : vector<8x1xf32> -> vector<8x1xf32>
    %257 = vector.broadcast %256 : vector<8x1xf32> to vector<8x8xf32>
    %258 = arith.mulf %253, %257 : vector<8x8xf32>
    %cst_100 = arith.constant dense<0.000000e+00> : vector<8x16xf32>
    %259 = tpu.matmul %258, %242, %cst_100 {dimension_numbers = #tpu.dot_dimension_numbers<[1], [0], [0], [1], [0, 0, 1, 1], [], []>} : vector<8x8xf32>, vector<8x16xf32>, vector<8x16xf32> -> vector<8x16xf32>
    %260 = tpu.concatenate %239, %259 in 1 : vector<8x16xf32>, vector<8x16xf32> -> vector<8x32xf32>
    %261 = vector.extract_strided_slice %25 {offsets = [1, 0], sizes = [1, 8], strides = [1, 1]} : vector<2x8xf32> to vector<1x8xf32>
    %262 = vector.extract_strided_slice %216 {offsets = [8, 0], sizes = [8, 16], strides = [1, 1]} : vector<16x32xf32> to vector<8x16xf32>
    %263 = vector.extract_strided_slice %217 {offsets = [8, 0], sizes = [8, 16], strides = [1, 1]} : vector<16x32xf32> to vector<8x16xf32>
    %264 = vector.extract_strided_slice %218 {offsets = [8, 0], sizes = [8, 16], strides = [1, 1]} : vector<16x32xf32> to vector<8x16xf32>
    %265 = tpu.transpose %263, [1, 0] : vector<8x16xf32> -> vector<16x8xf32>
    %cst_101 = arith.constant dense<0.000000e+00> : vector<8x8xf32>
    %266 = tpu.matmul %262, %265, %cst_101 {dimension_numbers = #tpu.dot_dimension_numbers<[1], [0], [0], [1], [0, 0, 1, 1], [], []>} : vector<8x16xf32>, vector<16x8xf32>, vector<8x8xf32> -> vector<8x8xf32>
    %cst_102 = arith.constant 2.500000e-01 : f32
    %267 = vector.broadcast %cst_102 : f32 to vector<8x8xf32>
    %268 = arith.mulf %266, %267 : vector<8x8xf32>
    %269 = vector.broadcast %261 : vector<1x8xf32> to vector<8x8xf32>
    %270 = arith.addf %268, %269 : vector<8x8xf32>
    %cst_103 = arith.constant dense<0xFF800000> : vector<8xf32>
    %271 = vector.multi_reduction <maximumf>, %270, %cst_103 [1] : vector<8x8xf32> to vector<8xf32>
    %272 = vector.shape_cast %271 : vector<8xf32> to vector<8x1xf32>
    %273 = vector.broadcast %272 : vector<8x1xf32> to vector<8x8xf32>
    %274 = arith.subf %270, %273 : vector<8x8xf32>
    %275 = math.exp %274 : vector<8x8xf32>
    %cst_104 = arith.constant dense<0.000000e+00> : vector<8xf32>
    %276 = vector.multi_reduction <add>, %275, %cst_104 [1] : vector<8x8xf32> to vector<8xf32>
    %277 = vector.shape_cast %276 : vector<8xf32> to vector<8x1xf32>
    %278 = tpu.reciprocal %277 {approx = true} : vector<8x1xf32> -> vector<8x1xf32>
    %279 = vector.broadcast %278 : vector<8x1xf32> to vector<8x8xf32>
    %280 = arith.mulf %275, %279 : vector<8x8xf32>
    %cst_105 = arith.constant dense<0.000000e+00> : vector<8x16xf32>
    %281 = tpu.matmul %280, %264, %cst_105 {dimension_numbers = #tpu.dot_dimension_numbers<[1], [0], [0], [1], [0, 0, 1, 1], [], []>} : vector<8x8xf32>, vector<8x16xf32>, vector<8x16xf32> -> vector<8x16xf32>
    %282 = vector.extract_strided_slice %216 {offsets = [8, 16], sizes = [8, 16], strides = [1, 1]} : vector<16x32xf32> to vector<8x16xf32>
    %283 = vector.extract_strided_slice %217 {offsets = [8, 16], sizes = [8, 16], strides = [1, 1]} : vector<16x32xf32> to vector<8x16xf32>
    %284 = vector.extract_strided_slice %218 {offsets = [8, 16], sizes = [8, 16], strides = [1, 1]} : vector<16x32xf32> to vector<8x16xf32>
    %285 = tpu.transpose %283, [1, 0] : vector<8x16xf32> -> vector<16x8xf32>
    %cst_106 = arith.constant dense<0.000000e+00> : vector<8x8xf32>
    %286 = tpu.matmul %282, %285, %cst_106 {dimension_numbers = #tpu.dot_dimension_numbers<[1], [0], [0], [1], [0, 0, 1, 1], [], []>} : vector<8x16xf32>, vector<16x8xf32>, vector<8x8xf32> -> vector<8x8xf32>
    %cst_107 = arith.constant 2.500000e-01 : f32
    %287 = vector.broadcast %cst_107 : f32 to vector<8x8xf32>
    %288 = arith.mulf %286, %287 : vector<8x8xf32>
    %289 = vector.broadcast %261 : vector<1x8xf32> to vector<8x8xf32>
    %290 = arith.addf %288, %289 : vector<8x8xf32>
    %cst_108 = arith.constant dense<0xFF800000> : vector<8xf32>
    %291 = vector.multi_reduction <maximumf>, %290, %cst_108 [1] : vector<8x8xf32> to vector<8xf32>
    %292 = vector.shape_cast %291 : vector<8xf32> to vector<8x1xf32>
    %293 = vector.broadcast %292 : vector<8x1xf32> to vector<8x8xf32>
    %294 = arith.subf %290, %293 : vector<8x8xf32>
    %295 = math.exp %294 : vector<8x8xf32>
    %cst_109 = arith.constant dense<0.000000e+00> : vector<8xf32>
    %296 = vector.multi_reduction <add>, %295, %cst_109 [1] : vector<8x8xf32> to vector<8xf32>
    %297 = vector.shape_cast %296 : vector<8xf32> to vector<8x1xf32>
    %298 = tpu.reciprocal %297 {approx = true} : vector<8x1xf32> -> vector<8x1xf32>
    %299 = vector.broadcast %298 : vector<8x1xf32> to vector<8x8xf32>
    %300 = arith.mulf %295, %299 : vector<8x8xf32>
    %cst_110 = arith.constant dense<0.000000e+00> : vector<8x16xf32>
    %301 = tpu.matmul %300, %284, %cst_110 {dimension_numbers = #tpu.dot_dimension_numbers<[1], [0], [0], [1], [0, 0, 1, 1], [], []>} : vector<8x8xf32>, vector<8x16xf32>, vector<8x16xf32> -> vector<8x16xf32>
    %302 = tpu.concatenate %281, %301 in 1 : vector<8x16xf32>, vector<8x16xf32> -> vector<8x32xf32>
    %303 = tpu.concatenate %260, %302 in 0 : vector<8x32xf32>, vector<8x32xf32> -> vector<16x32xf32>
    %c1_111 = arith.constant 1 : index
    %c0_112 = arith.constant 0 : index
    %c0_113 = arith.constant 0 : index
    %304 = vector.load %arg6[%c1_111, %c0_112, %c0_113] : memref<2x32x32xf32, #tpu.memory_space<vmem>>, vector<1x32x32xf32>
    %305 = vector.shape_cast %304 : vector<1x32x32xf32> to vector<32x32xf32>
    %cst_114 = arith.constant dense<0.000000e+00> : vector<16x32xf32>
    %306 = tpu.matmul %303, %305, %cst_114 {dimension_numbers = #tpu.dot_dimension_numbers<[1], [0], [0], [1], [0, 0, 1, 1], [], []>} : vector<16x32xf32>, vector<32x32xf32>, vector<16x32xf32> -> vector<16x32xf32>
    %c1_115 = arith.constant 1 : index
    %c0_116 = arith.constant 0 : index
    %c0_117 = arith.constant 0 : index
    %307 = vector.load %arg7[%c1_115, %c0_116, %c0_117] : memref<2x1x32xf32, #tpu.memory_space<vmem>>, vector<1x1x32xf32>
    %308 = vector.shape_cast %307 : vector<1x1x32xf32> to vector<1x32xf32>
    %309 = vector.broadcast %308 : vector<1x32xf32> to vector<16x32xf32>
    %310 = arith.addf %306, %309 : vector<16x32xf32>
    %311 = arith.addf %310, %208 : vector<16x32xf32>
    %c1_118 = arith.constant 1 : index
    %c0_119 = arith.constant 0 : index
    %c0_120 = arith.constant 0 : index
    %312 = vector.load %arg8[%c1_118, %c0_119, %c0_120] : memref<2x1x32xf32, #tpu.memory_space<vmem>>, vector<1x1x32xf32>
    %313 = vector.shape_cast %312 : vector<1x1x32xf32> to vector<1x32xf32>
    %c1_121 = arith.constant 1 : index
    %c0_122 = arith.constant 0 : index
    %c0_123 = arith.constant 0 : index
    %314 = vector.load %arg9[%c1_121, %c0_122, %c0_123] : memref<2x1x32xf32, #tpu.memory_space<vmem>>, vector<1x1x32xf32>
    %315 = vector.shape_cast %314 : vector<1x1x32xf32> to vector<1x32xf32>
    %cst_124 = arith.constant dense<0.000000e+00> : vector<16xf32>
    %316 = vector.multi_reduction <add>, %311, %cst_124 [1] : vector<16x32xf32> to vector<16xf32>
    %317 = vector.shape_cast %316 : vector<16xf32> to vector<16x1xf32>
    %cst_125 = arith.constant 3.200000e+01 : f32
    %318 = vector.broadcast %cst_125 : f32 to vector<16x1xf32>
    %319 = arith.divf %317, %318 : vector<16x1xf32>
    %320 = vector.broadcast %319 : vector<16x1xf32> to vector<16x32xf32>
    %321 = arith.subf %311, %320 : vector<16x32xf32>
    %322 = arith.mulf %321, %321 : vector<16x32xf32>
    %cst_126 = arith.constant dense<0.000000e+00> : vector<16xf32>
    %323 = vector.multi_reduction <add>, %322, %cst_126 [1] : vector<16x32xf32> to vector<16xf32>
    %324 = vector.shape_cast %323 : vector<16xf32> to vector<16x1xf32>
    %cst_127 = arith.constant 3.200000e+01 : f32
    %325 = vector.broadcast %cst_127 : f32 to vector<16x1xf32>
    %326 = arith.divf %324, %325 : vector<16x1xf32>
    %327 = vector.broadcast %319 : vector<16x1xf32> to vector<16x32xf32>
    %328 = arith.subf %311, %327 : vector<16x32xf32>
    %cst_128 = arith.constant 9.99999996E-13 : f32
    %329 = vector.broadcast %cst_128 : f32 to vector<16x1xf32>
    %330 = arith.addf %326, %329 : vector<16x1xf32>
    %331 = math.rsqrt %330 : vector<16x1xf32>
    %332 = vector.broadcast %331 : vector<16x1xf32> to vector<16x32xf32>
    %333 = arith.mulf %328, %332 : vector<16x32xf32>
    %334 = vector.broadcast %313 : vector<1x32xf32> to vector<16x32xf32>
    %335 = arith.mulf %333, %334 : vector<16x32xf32>
    %336 = vector.broadcast %315 : vector<1x32xf32> to vector<16x32xf32>
    %337 = arith.addf %335, %336 : vector<16x32xf32>
    %c1_129 = arith.constant 1 : index
    %c0_130 = arith.constant 0 : index
    %c0_131 = arith.constant 0 : index
    %338 = vector.load %arg10[%c1_129, %c0_130, %c0_131] : memref<2x32x64xf32, #tpu.memory_space<vmem>>, vector<1x32x64xf32>
    %339 = vector.shape_cast %338 : vector<1x32x64xf32> to vector<32x64xf32>
    %cst_132 = arith.constant dense<0.000000e+00> : vector<16x64xf32>
    %340 = tpu.matmul %337, %339, %cst_132 {dimension_numbers = #tpu.dot_dimension_numbers<[1], [0], [0], [1], [0, 0, 1, 1], [], []>} : vector<16x32xf32>, vector<32x64xf32>, vector<16x64xf32> -> vector<16x64xf32>
    %c1_133 = arith.constant 1 : index
    %c0_134 = arith.constant 0 : index
    %c0_135 = arith.constant 0 : index
    %341 = vector.load %arg11[%c1_133, %c0_134, %c0_135] : memref<2x1x64xf32, #tpu.memory_space<vmem>>, vector<1x1x64xf32>
    %342 = vector.shape_cast %341 : vector<1x1x64xf32> to vector<1x64xf32>
    %343 = vector.broadcast %342 : vector<1x64xf32> to vector<16x64xf32>
    %344 = arith.addf %340, %343 : vector<16x64xf32>
    %cst_136 = arith.constant 5.000000e-01 : f32
    %345 = vector.broadcast %cst_136 : f32 to vector<16x64xf32>
    %346 = arith.mulf %345, %344 : vector<16x64xf32>
    %cst_137 = arith.constant 4.471500e-02 : f32
    %347 = vector.broadcast %cst_137 : f32 to vector<16x64xf32>
    %348 = arith.mulf %347, %344 : vector<16x64xf32>
    %349 = arith.mulf %348, %344 : vector<16x64xf32>
    %350 = arith.mulf %349, %344 : vector<16x64xf32>
    %351 = arith.addf %344, %350 : vector<16x64xf32>
    %cst_138 = arith.constant 0.797884583 : f32
    %352 = vector.broadcast %cst_138 : f32 to vector<16x64xf32>
    %353 = arith.mulf %352, %351 : vector<16x64xf32>
    %354 = math.tanh %353 : vector<16x64xf32>
    %cst_139 = arith.constant 1.000000e+00 : f32
    %355 = vector.broadcast %cst_139 : f32 to vector<16x64xf32>
    %356 = arith.addf %355, %354 : vector<16x64xf32>
    %357 = arith.mulf %346, %356 : vector<16x64xf32>
    %c1_140 = arith.constant 1 : index
    %c0_141 = arith.constant 0 : index
    %c0_142 = arith.constant 0 : index
    %358 = vector.load %arg12[%c1_140, %c0_141, %c0_142] : memref<2x64x32xf32, #tpu.memory_space<vmem>>, vector<1x64x32xf32>
    %359 = vector.shape_cast %358 : vector<1x64x32xf32> to vector<64x32xf32>
    %cst_143 = arith.constant dense<0.000000e+00> : vector<16x32xf32>
    %360 = tpu.matmul %357, %359, %cst_143 {dimension_numbers = #tpu.dot_dimension_numbers<[1], [0], [0], [1], [0, 0, 1, 1], [], []>} : vector<16x64xf32>, vector<64x32xf32>, vector<16x32xf32> -> vector<16x32xf32>
    %c1_144 = arith.constant 1 : index
    %c0_145 = arith.constant 0 : index
    %c0_146 = arith.constant 0 : index
    %361 = vector.load %arg13[%c1_144, %c0_145, %c0_146] : memref<2x1x32xf32, #tpu.memory_space<vmem>>, vector<1x1x32xf32>
    %362 = vector.shape_cast %361 : vector<1x1x32xf32> to vector<1x32xf32>
    %363 = vector.broadcast %362 : vector<1x32xf32> to vector<16x32xf32>
    %364 = arith.addf %360, %363 : vector<16x32xf32>
    %365 = arith.addf %364, %337 : vector<16x32xf32>
    %c1_147 = arith.constant 1 : index
    %c0_148 = arith.constant 0 : index
    %c0_149 = arith.constant 0 : index
    %366 = vector.load %arg14[%c1_147, %c0_148, %c0_149] : memref<2x1x32xf32, #tpu.memory_space<vmem>>, vector<1x1x32xf32>
    %367 = vector.shape_cast %366 : vector<1x1x32xf32> to vector<1x32xf32>
    %c1_150 = arith.constant 1 : index
    %c0_151 = arith.constant 0 : index
    %c0_152 = arith.constant 0 : index
    %368 = vector.load %arg15[%c1_150, %c0_151, %c0_152] : memref<2x1x32xf32, #tpu.memory_space<vmem>>, vector<1x1x32xf32>
    %369 = vector.shape_cast %368 : vector<1x1x32xf32> to vector<1x32xf32>
    %cst_153 = arith.constant dense<0.000000e+00> : vector<16xf32>
    %370 = vector.multi_reduction <add>, %365, %cst_153 [1] : vector<16x32xf32> to vector<16xf32>
    %371 = vector.shape_cast %370 : vector<16xf32> to vector<16x1xf32>
    %cst_154 = arith.constant 3.200000e+01 : f32
    %372 = vector.broadcast %cst_154 : f32 to vector<16x1xf32>
    %373 = arith.divf %371, %372 : vector<16x1xf32>
    %374 = vector.broadcast %373 : vector<16x1xf32> to vector<16x32xf32>
    %375 = arith.subf %365, %374 : vector<16x32xf32>
    %376 = arith.mulf %375, %375 : vector<16x32xf32>
    %cst_155 = arith.constant dense<0.000000e+00> : vector<16xf32>
    %377 = vector.multi_reduction <add>, %376, %cst_155 [1] : vector<16x32xf32> to vector<16xf32>
    %378 = vector.shape_cast %377 : vector<16xf32> to vector<16x1xf32>
    %cst_156 = arith.constant 3.200000e+01 : f32
    %379 = vector.broadcast %cst_156 : f32 to vector<16x1xf32>
    %380 = arith.divf %378, %379 : vector<16x1xf32>
    %381 = vector.broadcast %373 : vector<16x1xf32> to vector<16x32xf32>
    %382 = arith.subf %365, %381 : vector<16x32xf32>
    %cst_157 = arith.constant 9.99999996E-13 : f32
    %383 = vector.broadcast %cst_157 : f32 to vector<16x1xf32>
    %384 = arith.addf %380, %383 : vector<16x1xf32>
    %385 = math.rsqrt %384 : vector<16x1xf32>
    %386 = vector.broadcast %385 : vector<16x1xf32> to vector<16x32xf32>
    %387 = arith.mulf %382, %386 : vector<16x32xf32>
    %388 = vector.broadcast %367 : vector<1x32xf32> to vector<16x32xf32>
    %389 = arith.mulf %387, %388 : vector<16x32xf32>
    %390 = vector.broadcast %369 : vector<1x32xf32> to vector<16x32xf32>
    %391 = arith.addf %389, %390 : vector<16x32xf32>
    %392 = vector.extract_strided_slice %391 {offsets = [0, 0], sizes = [1, 32], strides = [1, 1]} : vector<16x32xf32> to vector<1x32xf32>
    %393 = vector.extract_strided_slice %391 {offsets = [8, 0], sizes = [1, 32], strides = [1, 1]} : vector<16x32xf32> to vector<1x32xf32>
    %394 = tpu.concatenate %392, %393 in 0 : vector<1x32xf32>, vector<1x32xf32> -> vector<2x32xf32>
    %c0_158 = arith.constant 0 : index
    %c0_159 = arith.constant 0 : index
    %395 = vector.load %arg16[%c0_158, %c0_159] : memref<32x32xf32, #tpu.memory_space<vmem>>, vector<32x32xf32>
    %cst_160 = arith.constant dense<0.000000e+00> : vector<2x32xf32>
    %396 = tpu.matmul %394, %395, %cst_160 {dimension_numbers = #tpu.dot_dimension_numbers<[1], [0], [0], [1], [0, 0, 1, 1], [], []>} : vector<2x32xf32>, vector<32x32xf32>, vector<2x32xf32> -> vector<2x32xf32>
    %c0_161 = arith.constant 0 : index
    %c0_162 = arith.constant 0 : index
    %397 = vector.load %arg17[%c0_161, %c0_162] : memref<1x32xf32, #tpu.memory_space<vmem>>, vector<1x32xf32>
    %398 = vector.broadcast %397 : vector<1x32xf32> to vector<2x32xf32>
    %399 = arith.addf %396, %398 : vector<2x32xf32>
    %400 = math.tanh %399 : vector<2x32xf32>
    %c0_163 = arith.constant 0 : index
    %c0_164 = arith.constant 0 : index
    %401 = vector.load %arg18[%c0_163, %c0_164] : memref<32x128xf32, #tpu.memory_space<vmem>>, vector<32x128xf32>
    %cst_165 = arith.constant dense<0.000000e+00> : vector<2x128xf32>
    %402 = tpu.matmul %400, %401, %cst_165 {dimension_numbers = #tpu.dot_dimension_numbers<[1], [0], [0], [1], [0, 0, 1, 1], [], []>} : vector<2x32xf32>, vector<32x128xf32>, vector<2x128xf32> -> vector<2x128xf32>
    %c0_166 = arith.constant 0 : index
    %c0_167 = arith.constant 0 : index
    %403 = vector.load %arg19[%c0_166, %c0_167] : memref<1x128xf32, #tpu.memory_space<vmem>>, vector<1x128xf32>
    %404 = vector.broadcast %403 : vector<1x128xf32> to vector<2x128xf32>
    %405 = arith.addf %402, %404 : vector<2x128xf32>
    %c0_168 = arith.constant 0 : index
    %c0_169 = arith.constant 0 : index
    %406 = vector.load %arg20[%c0_168, %c0_169] : memref<2x128xf32, #tpu.memory_space<vmem>>, vector<2x128xf32>
    tpu.vector_store %arg20[%c0_168, %c0_169], %405 {strides = array<i32>} : memref<2x128xf32, #tpu.memory_space<vmem>>, vector<2x128xf32>,
    return
  }
}

</mosaic_0001>

<bundles_post_ra>
// kernel: color_predictor_forward.1
= control target key start
LH: loop header
LB: loop body
LE: loop exit
PB: predicated region body
PF: predicated region fallthrough
CT: control target
= control target key end

     0   :  { %s3783_s0 = inlined_call_operand.vmem [shape: f32[16,32], index: 0, kind: input, shape index: {}]   ;;  %s3784_s1 = inlined_call_operand.vmem [shape: f32[2,8], index: 1, kind: input, shape index: {}]   ;;  %s3785_s2 = inlined_call_operand.vmem [shape: f32[1,32], index: 2, kind: input, shape index: {}]   ;;  %s3786_s3 = inlined_call_operand.vmem [shape: f32[1,32], index: 3, kind: input, shape index: {}]   ;;  %s3787_s4 = inlined_call_operand.vmem [shape: f32[2,32,96], index: 4, kind: input, shape index: {}]   ;;  %s3788_s5 = inlined_call_operand.vmem [shape: f32[2,1,96], index: 5, kind: input, shape index: {}]   ;;  %s3789_s6 = inlined_call_operand.vmem [shape: f32[2,32,32], index: 6, kind: input, shape index: {}]   ;;  %s3790_s7 = inlined_call_operand.vmem [shape: f32[2,1,32], index: 7, kind: input, shape index: {}]   ;;  %s3791_s8 = inlined_call_operand.vmem [shape: f32[2,1,32], index: 8, kind: input, shape index: {}]   ;;  %s3792_s9 = inlined_call_operand.vmem [shape: f32[2,1,32], index: 9, kind: input, shape index: {}]   ;;  %s3793_s10 = inlined_call_operand.vmem [shape: f32[2,32,64], index: 10, kind: input, shape index: {}]   ;;  %s3794_s11 = inlined_call_operand.vmem [shape: f32[2,1,64], index: 11, kind: input, shape index: {}]   ;;  %s3795_s12 = inlined_call_operand.vmem [shape: f32[2,64,32], index: 12, kind: input, shape index: {}]   ;;  %s3796_s13 = inlined_call_operand.vmem [shape: f32[2,1,32], index: 13, kind: input, shape index: {}]   ;;  %s3797_s14 = inlined_call_operand.vmem [shape: f32[2,1,32], index: 14, kind: input, shape index: {}]   ;;  %s3798_s15 = inlined_call_operand.vmem [shape: f32[2,1,32], index: 15, kind: input, shape index: {}]   ;;  %s3799_s16 = inlined_call_operand.vmem [shape: f32[32,32], index: 16, kind: input, shape index: {}]   ;;  %s3800_s17 = inlined_call_operand.vmem [shape: f32[1,32], index: 17, kind: input, shape index: {}]   ;;  %s3801_s18 = inlined_call_operand.vmem [shape: f32[32,128], index: 18, kind: input, shape index: {}]   ;;  %s3802_s19 = inlined_call_operand.vmem [shape: f32[1,128], index: 19, kind: input, shape index: {}]   ;;  %s3803_s20 = inlined_call_operand.hbm [shape: f32[2,128], index: 20, kind: output, shape index: {}]  }
   0x1   :  { %3810 = sst [smem:[#allocation5_spill]] %s3783_s0 }
   0x2   :  { %3811 = sst [smem:[#allocation6_spill]] %s3784_s1 }
   0x3   :  { %3812 = sst [smem:[#allocation7_spill]] %s3785_s2 }
   0x4   :  { %3813 = sst [smem:[#allocation8_spill]] %s3786_s3 }
   0x5   :  { %3814 = sst [smem:[#allocation9_spill]] %s3787_s4 }
   0x6   :  { %s3815_s23 = sld [smem:[#allocation5_spill]]  ;;  %vm70_vm0 = vcmask 261120  }
   0xc   :  { %v66_v0 = vld [vmem:[%s3815_s23] sm:$0xff]  ;;  %v67_v1 = vld [vmem:[%s3815_s23 + $0x8] sm:$0xff] }
   0xd   :  { %25 = vsyncpa [#allocation3], 0  ;;  %v71_v2 = vsel %vm70_vm0, %v66_v0, 0.0  ;;  %v74_v3 = vsel %vm70_vm0, %v67_v1, 0.0  ;;  %s3816_s26 = sld [smem:[#allocation9_spill]]  ;;  %s3817_s22 = sld [smem:[#allocation7_spill]]  ;;  %v286_v48 = vlaneseq }
   0xe   :  { %72 = vadd.xlane.f32.xlu0 %v71_v2  ;;  %s3818_s2 = sld [smem:[#allocation8_spill]]  ;;  %v3225_v36 = vmov 0.0   ;;  %vm3226_vm1 = vmmov 0   ;;  %v2645_v37 = vld [vmem:[%s3788_s5] ss:$0 sm:$0xff]  ;;  %s3227_s27 = smov 80  }
   0xf   :  { %2842 = vmatprep.subr.mxu1 %v3225_v36  ;;  %2844 = vmatprep.mubr.msk.f32.mxu1 %vm3226_vm1, %v3225_v36  ;;  %s3228_s28 = smov 96   ;;  %s3229_s4 = smov 112   ;;  %vm210_vm2 = vcmask 130048   ;;  %v287_v49 = vshrl.u32 %v286_v48, 7  ;;  %vm291_vm3 = vcmask 64512   ;;  %vm1156_vm4 = vcmask 523264  }
  0x10   :  { %s3819_s0 = sld [smem:[#allocation6_spill]]  ;;  %s3230_s21 = smov 48   ;;  %vm2457_vm5 = vcmask 1040384  }
  0x11   :  { %v288_v50 = vsub.s32 0, %v287_v49  ;;  %v631_v60 = vsub.s32 1, %v287_v49  ;;  %s3808_s1 = smov 64  }
  0x12   :  { %75 = vadd.xlane.f32.xlu0 %v74_v3 }
  0x13   :  { %v115_v14 = vld [vmem:[%s3816_s26] sm:$0xff]  ;;  %v116_v15 = vld [vmem:[%s3816_s26 + $0x8] sm:$0xff]  ;;  %v117_v16 = vld [vmem:[%s3816_s26 + $0x10] sm:$0xff] }
  0x14   :  { %v3037_v17 = vpack.c.bf16 %v116_v15, %v115_v14  ;;  %v118_v18 = vld [vmem:[%s3816_s26 + $0x18] sm:$0xff]  ;;  %v2643_v27 = vld [vmem:[%s3817_s22] ss:$0 sm:$0xff] }
  0x15   :  { %v3041_v19 = vpack.c.bf16 %v118_v18, %v117_v16  ;;  %v2644_v29 = vld [vmem:[%s3818_s2] ss:$0 sm:$0xff] }
  0x16   :  { %3038 = vmatprep.subr.bf16.mxu0 %v3037_v17  ;;  %v114_v51 = vld [vmem:[%s3819_s0] sm:$0x3]  ;;  %s3806_s0 = smov 16  }
  0x17   :  { %3040 = vmatpush3.bf16.msra.mxu0 %v3037_v17  ;;  %v3423_v52 = vrot.slane %v114_v51, %v288_v50  ;;  %v893_v50 = vld [vmem:[%s3789_s6] sm:$0xff] }
  0x18   :  { %3042 = vmatprep.subr.bf16.mxu0 %v3041_v19 }
  0x1b   :  { %3044 = vmatpush3.bf16.msra.mxu0 %v3041_v19 }
  0x1c   :  { %2852 = vmatprep.subr.mxu0 %v3225_v36 }
  0x9b   :  { %v73_v4 = vpop.xlane.xlu0 %72 }
  0x9c   :  { %v78_v5 = vmul.f32 0.03125, %v73_v4 }
  0x9e   :  { %v80_v6 = vsub.f32 %v66_v0, %v78_v5  ;;  %v3429_v0 = vrot.slane %v114_v51, %v631_v60  ;;  %v894_v51 = vld [vmem:[%s3789_s6 + $0x8] sm:$0xff] }
  0x9f   :  { %v76_v7 = vpop.xlane.xlu0 %75 }
  0xa0   :  { %v79_v8 = vmul.f32 0.03125, %v76_v7  ;;  %v82_v9 = vmul.f32 %v80_v6, %v80_v6 }
  0xa2   :  { %v81_v10 = vsub.f32 %v67_v1, %v79_v8  ;;  %v84_v11 = vsel %vm70_vm0, %v82_v9, 0.0 }
  0xa3   :  { %85 = vadd.xlane.f32.xlu1 %v84_v11 }
  0xa4   :  { %v83_v12 = vmul.f32 %v81_v10, %v81_v10 }
  0xa6   :  { %v87_v13 = vsel %vm70_vm0, %v83_v12, 0.0 }
  0xa7   :  { %88 = vadd.xlane.f32.xlu1 %v87_v13 }
 0x130   :  { %v86_v20 = vpop.xlane.xlu1 %85 }
 0x131   :  { %v90_v21 = vmul.f32 0.03125, %v86_v20 }
 0x133   :  { %v92_v22 = vadd.f32 1e-12, %v90_v21 }
 0x134   :  { %v89_v23 = vpop.xlane.xlu1 %88 }
 0x135   :  { %3139 = vrsqrt.f32 %v92_v22  ;;  %v91_v24 = vmul.f32 0.03125, %v89_v23 }
 0x137   :  { %v93_v25 = vadd.f32 1e-12, %v91_v24 }
 0x139   :  { %3141 = vrsqrt.f32 %v93_v25 }
 0x13f   :  { %v3140_v26 = vpop.eup %3139 }
 0x140   :  { %v96_v28 = vmul.f32 %v3140_v26, %v80_v6 }
 0x142   :  { %v104_v30 = vmul.f32 %v2643_v27, %v96_v28 }
 0x143   :  { %v3142_v31 = vpop.eup %3141 }
 0x144   :  { %v97_v32 = vmul.f32 %v3142_v31, %v81_v10  ;;  %v3368_v33 = vadd.f32 %v2644_v29, %v104_v30 }
 0x146   :  { %v105_v34 = vmul.f32 %v2643_v27, %v97_v32  ;;  %2839 = vmatprep.mubr.msk.f32.mxu0 %vm70_vm0, %v3368_v33 }
 0x148   :  { %v3372_v35 = vadd.f32 %v2644_v29, %v105_v34 }
 0x14a   :  { %2840 = vmatmul.mubr.msk.f32.vlgmr.msra.gmra.mrb[0].mxu0 %vm70_vm0, %v3372_v35 }
 0x14b   :  { %2854 = vmatprep.mubr.msk.f32.mxu0 %vm3226_vm1, %v3225_v36 }
 0x21d   :  { %v2841_v38 = vpop.f32.mrb[0].mxu0 }
 0x21e   :  { %v198_v39 = vpop.f32.mrb[1].mxu0  ;;  %v3391_v41 = vadd.f32 %v2841_v38, %v2645_v37 }
 0x21f   :  { %v3385_v40 = vadd.f32 %v2645_v37, %v198_v39 }
 0x221   :  { %381 = vrot.lane.b32.xlu1 %v3385_v40, %s3227_s27  ;;  %208 = vrot.lane.b32.xlu0 %v3385_v40, %s3228_s28 }
 0x225   :  { %379 = vrot.lane.b32.xlu1 %v3385_v40, %s3229_s4  ;;  %723 = vrot.lane.b32.xlu0 %v3391_v41, %s3227_s27 }
 0x229   :  { %552 = vrot.lane.b32.xlu1 %v3391_v41, %s3228_s28 }
 0x22d   :  { %721 = vrot.lane.b32.xlu1 %v3391_v41, %s3229_s4 }
 0x293   :  { %v382_v42 = vpop.permute.xlu1 %381  ;;  %v209_v43 = vpop.permute.xlu0 %208 }
 0x294   :  { %2843 = vmatpush3.xpose.msk.msra.mxu1 %vm210_vm2, %v209_v43  ;;  %2853 = vmatpush3.xpose.msk.msra.mxu0 %vm210_vm2, %v382_v42 }
 0x295   :  { %2862 = vmatprep.subr.mxu0 %v3225_v36  ;;  %2847 = vmatprep.subr.mxu1 %v3225_v36 }
 0x297   :  { %v380_v44 = vpop.permute.xlu1 %379  ;;  %2845 = vmatmul.mubr.msk.f32.vlgmr.msra.gmra.mrb[0].mxu1 %vm210_vm2, %v3385_v40  ;;  %v724_v46 = vpop.permute.xlu0 %723 }
 0x298   :  { %2855 = vmatmul.mubr.msk.f32.vlgmr.msra.gmra.mrb[2].mxu0 %vm210_vm2, %v380_v44  ;;  %2849 = vmatprep.mubr.msk.f32.mxu1 %vm3226_vm1, %v3225_v36 }
 0x299   :  { %2864 = vmatprep.mubr.msk.f32.mxu0 %vm3226_vm1, %v3225_v36 }
 0x29b   :  { %v553_v45 = vpop.permute.xlu1 %552 }
 0x29c   :  { %2863 = vmatpush3.xpose.msk.msra.mxu0 %vm210_vm2, %v553_v45 }
 0x29d   :  { %2872 = vmatprep.subr.mxu0 %v3225_v36 }
 0x29f   :  { %2865 = vmatmul.mubr.msk.f32.vlgmr.msra.gmra.mrb[4].mxu0 %vm210_vm2, %v3391_v41  ;;  %v722_v47 = vpop.permute.xlu1 %721 }
 0x2a0   :  { %2873 = vmatpush3.xpose.msk.msra.mxu0 %vm210_vm2, %v724_v46  ;;  %2874 = vmatprep.mubr.msk.f32.mxu0 %vm3226_vm1, %v3225_v36 }
 0x2a3   :  { %2875 = vmatmul.mubr.msk.f32.vlgmr.msra.gmra.mrb[6].mxu0 %vm210_vm2, %v722_v47 }
 0x36a   :  { %v281_v53 = vpop.f32.mrb[0].mxu1 }
 0x36b   :  { %v285_v54 = vmul.f32 0.25, %v281_v53  ;;  %v2846_v55 = vpop.f32.mrb[1].mxu1  ;;  %v453_v56 = vpop.f32.mrb[2].mxu0  ;;  %v895_v53 = vld [vmem:[%s3789_s6 + $0x10] sm:$0xff] }
 0x36c   :  { %v457_v57 = vmul.f32 0.25, %v453_v56  ;;  %v2856_v58 = vpop.f32.mrb[3].mxu0  ;;  %v896_v55 = vld [vmem:[%s3789_s6 + $0x18] sm:$0xff] }
 0x36d   :  { %v290_v59 = vadd.f32 %v3423_v52, %v285_v54  ;;  %v3045_v54 = vpack.c.bf16 %v894_v51, %v893_v50  ;;  %v3049_v56 = vpack.c.bf16 %v896_v55, %v895_v53  ;;  %v1143_v51 = vld [vmem:[%s3795_s12 + $0x10] sm:$0xff]  ;;  %v1144_v53 = vld [vmem:[%s3795_s12 + $0x18] sm:$0xff]  ;;  %v1145_v55 = vld [vmem:[%s3795_s12 + $0x20] sm:$0xff] }
 0x36e   :  { %v458_v61 = vadd.f32 %v457_v57, %v3423_v52 }
 0x36f   :  { %v292_v62 = vsel %vm291_vm3, %v290_v59, -inf  ;;  %3046 = vmatprep.subr.bf16.mxu0 %v3045_v54 }
 0x370   :  { %293 = vmax.xlane.f32.xlu0 %v292_v62  ;;  %v459_v63 = vsel %vm291_vm3, %v458_v61, -inf  ;;  %3048 = vmatpush3.bf16.msra.mxu0 %v3045_v54  ;;  %v3065_v54 = vpack.c.bf16 %v1144_v53, %v1143_v51 }
 0x371   :  { %460 = vmax.xlane.f32.xlu1 %v459_v63  ;;  %3050 = vmatprep.subr.bf16.mxu0 %v3049_v56 }
 0x372   :  { %v624_v1 = vpop.f32.mrb[4].mxu0 }
 0x373   :  { %v628_v2 = vmul.f32 0.25, %v624_v1  ;;  %v2866_v3 = vpop.f32.mrb[5].mxu0 }
 0x374   :  { %3052 = vmatpush3.bf16.msra.mxu0 %v3049_v56  ;;  %v1146_v56 = vld [vmem:[%s3795_s12 + $0x28] sm:$0xff] }
 0x375   :  { %v633_v4 = vadd.f32 %v3429_v0, %v628_v2 }
 0x376   :  { %v795_v5 = vpop.f32.mrb[6].mxu0 }
 0x377   :  { %v799_v6 = vmul.f32 0.25, %v795_v5  ;;  %v2876_v7 = vpop.f32.mrb[7].mxu0  ;;  %v634_v8 = vsel %vm291_vm3, %v633_v4, -inf }
 0x378   :  { %635 = vmax.xlane.f32.xlu0 %v634_v8 }
 0x379   :  { %v800_v9 = vadd.f32 %v799_v6, %v3429_v0  ;;  %v2660_v6 = vld [vmem:[%s3790_s7] ss:$0 sm:$0xff] }
 0x37b   :  { %v801_v10 = vsel %vm291_vm3, %v800_v9, -inf }
 0x37c   :  { %802 = vmax.xlane.f32.xlu0 %v801_v10 }
 0x3fd   :  { %v294_v11 = vpop.xlane.xlu0 %293 }
 0x3fe   :  { %v295_v12 = vsub.f32 %v290_v59, %v294_v11  ;;  %v461_v13 = vpop.xlane.xlu1 %460 }
 0x3ff   :  { %v462_v14 = vsub.f32 %v458_v61, %v461_v13 }
 0x400   :  { %v296_v15 = vmul.f32 1.442695, %v295_v12 }
 0x401   :  { %v463_v16 = vmul.f32 1.442695, %v462_v14 }
 0x402   :  { %3143 = vpow2.f32 %v296_v15 }
 0x403   :  { %3145 = vpow2.f32 %v463_v16 }
 0x405   :  { %v636_v17 = vpop.xlane.xlu0 %635 }
 0x406   :  { %v637_v18 = vsub.f32 %v633_v4, %v636_v17 }
 0x408   :  { %v638_v19 = vmul.f32 1.442695, %v637_v18 }
 0x409   :  { %v803_v26 = vpop.xlane.xlu0 %802 }
 0x40a   :  { %3147 = vpow2.f32 %v638_v19  ;;  %v804_v27 = vsub.f32 %v800_v9, %v803_v26  ;;  %v1033_v26 = vld [vmem:[%s3793_s10 + $0x10] sm:$0xff] }
 0x40c   :  { %v3144_v20 = vpop.eup %3143  ;;  %v805_v28 = vmul.f32 1.442695, %v804_v27  ;;  %v1034_v27 = vld [vmem:[%s3793_s10 + $0x18] sm:$0xff] }
 0x40d   :  { %v3146_v21 = vpop.eup %3145  ;;  %v298_v22 = vsel %vm291_vm3, %v3144_v20, 0.0 }
 0x40e   :  { %299 = vadd.xlane.f32.xlu0 %v298_v22  ;;  %v465_v23 = vsel %vm291_vm3, %v3146_v21, 0.0  ;;  %3149 = vpow2.f32 %v805_v28  ;;  %v3057_v28 = vpack.c.bf16 %v1034_v27, %v1033_v26 }
 0x40f   :  { %466 = vadd.xlane.f32.xlu1 %v465_v23 }
 0x414   :  { %v3148_v24 = vpop.eup %3147 }
 0x415   :  { %v640_v25 = vsel %vm291_vm3, %v3148_v24, 0.0 }
 0x416   :  { %641 = vadd.xlane.f32.xlu0 %v640_v25 }
 0x418   :  { %v3150_v29 = vpop.eup %3149 }
 0x419   :  { %v807_v30 = vsel %vm291_vm3, %v3150_v29, 0.0 }
 0x420   :  { %470 = vrot.lane.b32.xlu1 %v3385_v40, %s3230_s21 }
 0x424   :  { %645 = vrot.lane.b32.xlu1 %v3391_v41, %s3808_s1 }
 0x42c   :  { %303 = vrot.lane.b32.xlu0 %v3385_v40, %s3808_s1 }
 0x448   :  { %808 = vadd.xlane.f32.xlu1 %v807_v30 }
 0x459   :  { %812 = vrot.lane.b32.xlu1 %v3391_v41, %s3230_s21 }
 0x49b   :  { %v300_v31 = vpop.xlane.xlu0 %299 }
 0x49c   :  { %3151 = vrcp.f32 %v300_v31  ;;  %v467_v32 = vpop.xlane.xlu1 %466 }
 0x49d   :  { %3153 = vrcp.f32 %v467_v32 }
 0x4a0   :  { %v471_v39 = vpop.permute.xlu1 %470 }
 0x4a3   :  { %v642_v34 = vpop.xlane.xlu0 %641 }
 0x4a4   :  { %3155 = vrcp.f32 %v642_v34  ;;  %v646_v43 = vpop.permute.xlu1 %645 }
 0x4a6   :  { %v3152_v37 = vpop.eup %3151 }
 0x4a7   :  { %v302_v38 = vmul.f32 %v3152_v37, %v3144_v20  ;;  %v304_v40 = vpop.permute.xlu0 %303  ;;  %v3154_v42 = vpop.eup %3153 }
 0x4a8   :  { %2848 = vmatpush3.msra.mxu1 %v304_v40  ;;  %v469_v41 = vmul.f32 %v3154_v42, %v3146_v21  ;;  %v2664_v42 = vld [vmem:[%s3792_s9] ss:$0 sm:$0xff] }
 0x4a9   :  { %2850 = vmatmul.mubr.msk.f32.vlgmr.msra.gmra.mrb[2].mxu1 %vm291_vm3, %v302_v38  ;;  %2857 = vmatprep.subr.mxu1 %v3225_v36 }
 0x4aa   :  { %2858 = vmatpush3.msra.mxu1 %v471_v39  ;;  %2859 = vmatprep.mubr.msk.f32.mxu1 %vm3226_vm1, %v3225_v36  ;;  %v2663_v39 = vld [vmem:[%s3791_s8] ss:$0 sm:$0xff] }
 0x4ab   :  { %2867 = vmatprep.subr.mxu1 %v3225_v36 }
 0x4ad   :  { %2860 = vmatmul.mubr.msk.f32.vlgmr.msra.gmra.mrb[4].mxu1 %vm291_vm3, %v469_v41 }
 0x4ae   :  { %v3156_v44 = vpop.eup %3155  ;;  %2868 = vmatpush3.msra.mxu1 %v646_v43  ;;  %2869 = vmatprep.mubr.msk.f32.mxu1 %vm3226_vm1, %v3225_v36 }
 0x4af   :  { %v644_v45 = vmul.f32 %v3156_v44, %v3148_v24  ;;  %2877 = vmatprep.subr.mxu1 %v3225_v36  ;;  %v1032_v24 = vld [vmem:[%s3793_s10 + $0x8] sm:$0xff] }
 0x4b1   :  { %2870 = vmatmul.mubr.msk.f32.vlgmr.msra.gmra.mrb[6].mxu1 %vm291_vm3, %v644_v45 }
 0x4b2   :  { %2879 = vmatprep.mubr.msk.f32.mxu1 %vm3226_vm1, %v3225_v36 }
 0x4d5   :  { %v809_v46 = vpop.xlane.xlu1 %808 }
 0x4d6   :  { %3157 = vrcp.f32 %v809_v46 }
 0x4d9   :  { %v813_v47 = vpop.permute.xlu1 %812 }
 0x4da   :  { %2878 = vmatpush3.msra.mxu1 %v813_v47 }
 0x4e0   :  { %v3158_v48 = vpop.eup %3157 }
 0x4e1   :  { %v811_v49 = vmul.f32 %v3158_v48, %v3150_v29  ;;  %v1141_v48 = vld [vmem:[%s3795_s12] sm:$0xff] }
 0x4e3   :  { %2880 = vmatmul.mubr.msk.f32.vlgmr.msra.gmra.mrb[8].mxu1 %vm291_vm3, %v811_v49  ;;  %v1142_v49 = vld [vmem:[%s3795_s12 + $0x8] sm:$0xff] }
 0x4e4   :  { %v3061_v50 = vpack.c.bf16 %v1142_v49, %v1141_v48 }
 0x4e6   :  { %3062 = vmatprep.subr.bf16.mxu0 %v3061_v50 }
 0x57c   :  { %v375_v57 = vpop.f32.mrb[2].mxu1 }
 0x57d   :  { %v2851_v58 = vpop.f32.mrb[3].mxu1 }
 0x57e   :  { %v1147_v58 = vld [vmem:[%s3795_s12 + $0x30] sm:$0xff] }
 0x580   :  { %v542_v59 = vpop.f32.mrb[4].mxu1 }
 0x581   :  { %547 = vrot.lane.b32.xlu0 %v542_v59, %s3806_s0  ;;  %v2861_v60 = vpop.f32.mrb[5].mxu1  ;;  %v1148_v59 = vld [vmem:[%s3795_s12 + $0x38] sm:$0xff] }
 0x582   :  { %v3073_v60 = vpack.c.bf16 %v1148_v59, %v1147_v58  ;;  %v2672_v59 = vld [vmem:[%s3798_s15] ss:$0 sm:$0xff] }
 0x584   :  { %v717_v61 = vpop.f32.mrb[6].mxu1 }
 0x585   :  { %v2871_v62 = vpop.f32.mrb[7].mxu1 }
 0x5b6   :  { %v884_v63 = vpop.f32.mrb[8].mxu1 }
 0x5b7   :  { %889 = vrot.lane.b32.xlu1 %v884_v63, %s3806_s0  ;;  %v2881_v1 = vpop.f32.mrb[9].mxu1  ;;  %s3821_s0 = smov 16  }
 0x5f3   :  { %v548_v2 = vpop.permute.xlu0 %547 }
 0x5f4   :  { %v550_v3 = vsel %vm210_vm2, %v375_v57, %v548_v2  ;;  %v3069_v57 = vpack.c.bf16 %v1146_v56, %v1145_v55  ;;  %v2671_v55 = vld [vmem:[%s3797_s14] ss:$0 sm:$0xff] }
 0x5f5   :  { %2890 = vmatprep.mubr.msk.f32.mxu0 %vm70_vm0, %v550_v3 }
 0x629   :  { %v890_v4 = vpop.permute.xlu1 %889 }
 0x62a   :  { %v892_v5 = vsel %vm210_vm2, %v717_v61, %v890_v4  ;;  %v2665_v61 = vld [vmem:[%s3794_s11] ss:$0 sm:$0xff] }
 0x62b   :  { %2891 = vmatmul.mubr.msk.f32.vlgmr.msra.gmra.mrb[8].mxu0 %vm70_vm0, %v892_v5 }
 0x62c   :  { %3064 = vmatpush3.bf16.msra.mxu0 %v3061_v50 }
 0x62d   :  { %3066 = vmatprep.subr.bf16.mxu0 %v3065_v54 }
 0x630   :  { %3068 = vmatpush3.bf16.msra.mxu0 %v3065_v54 }
 0x631   :  { %3070 = vmatprep.subr.bf16.mxu0 %v3069_v57 }
 0x634   :  { %3072 = vmatpush3.bf16.msra.mxu0 %v3069_v57 }
 0x635   :  { %3074 = vmatprep.subr.bf16.mxu0 %v3073_v60 }
 0x638   :  { %3076 = vmatpush3.bf16.msra.mxu0 %v3073_v60 }
 0x639   :  { %2944 = vmatprep.subr.mxu0 %v3225_v36 }
 0x6fe   :  { %v2892_v7 = vpop.f32.mrb[8].mxu0 }
 0x6ff   :  { %v982_v8 = vadd.f32 %v2892_v7, %v2660_v6  ;;  %v976_v9 = vpop.f32.mrb[9].mxu0 }
 0x700   :  { %v977_v10 = vadd.f32 %v2660_v6, %v976_v9 }
 0x701   :  { %v986_v11 = vadd.f32 %v982_v8, %v3372_v35 }
 0x702   :  { %v985_v12 = vadd.f32 %v977_v10, %v3368_v33  ;;  %v1031_v33 = vld [vmem:[%s3793_s10] sm:$0xff] }
 0x703   :  { %v992_v13 = vsel %vm70_vm0, %v986_v11, 0.0  ;;  %v3053_v25 = vpack.c.bf16 %v1032_v24, %v1031_v33 }
 0x704   :  { %993 = vadd.xlane.f32.xlu1 %v992_v13  ;;  %v989_v14 = vsel %vm70_vm0, %v985_v12, 0.0 }
 0x705   :  { %990 = vadd.xlane.f32.xlu0 %v989_v14  ;;  %3054 = vmatprep.subr.bf16.mxu1 %v3053_v25 }
 0x706   :  { %3056 = vmatpush3.bf16.msra.mxu1 %v3053_v25 }
 0x707   :  { %3058 = vmatprep.subr.bf16.mxu1 %v3057_v28 }
 0x70a   :  { %3060 = vmatpush3.bf16.msra.mxu1 %v3057_v28 }
 0x791   :  { %v994_v15 = vpop.xlane.xlu1 %993 }
 0x792   :  { %v996_v16 = vmul.f32 0.03125, %v994_v15  ;;  %v991_v17 = vpop.xlane.xlu0 %990 }
 0x793   :  { %v995_v18 = vmul.f32 0.03125, %v991_v17 }
 0x794   :  { %v998_v19 = vsub.f32 %v986_v11, %v996_v16 }
 0x795   :  { %v997_v20 = vsub.f32 %v985_v12, %v995_v18 }
 0x796   :  { %v1000_v23 = vmul.f32 %v998_v19, %v998_v19 }
 0x797   :  { %v999_v21 = vmul.f32 %v997_v20, %v997_v20 }
 0x798   :  { %v1004_v35 = vsel %vm70_vm0, %v1000_v23, 0.0 }
 0x799   :  { %v1001_v22 = vsel %vm70_vm0, %v999_v21, 0.0  ;;  %v2668_v21 = vld [vmem:[%s3796_s13] ss:$0 sm:$0xff] }
 0x79a   :  { %1002 = vadd.xlane.f32.xlu0 %v1001_v22 }
 0x79e   :  { %1005 = vadd.xlane.f32.xlu0 %v1004_v35 }
 0x827   :  { %v1003_v29 = vpop.xlane.xlu0 %1002 }
 0x828   :  { %v1007_v30 = vmul.f32 0.03125, %v1003_v29 }
 0x82a   :  { %v1009_v31 = vadd.f32 1e-12, %v1007_v30 }
 0x82b   :  { %v1006_v32 = vpop.xlane.xlu0 %1005 }
 0x82c   :  { %3159 = vrsqrt.f32 %v1009_v31  ;;  %v1008_v34 = vmul.f32 0.03125, %v1006_v32 }
 0x82e   :  { %v1010_v37 = vadd.f32 1e-12, %v1008_v34 }
 0x830   :  { %3161 = vrsqrt.f32 %v1010_v37 }
 0x836   :  { %v3160_v38 = vpop.eup %3159 }
 0x837   :  { %v1013_v40 = vmul.f32 %v3160_v38, %v997_v20 }
 0x839   :  { %v1021_v41 = vmul.f32 %v2663_v39, %v1013_v40 }
 0x83a   :  { %v3162_v43 = vpop.eup %3161 }
 0x83b   :  { %v1014_v44 = vmul.f32 %v3162_v43, %v998_v19  ;;  %v1029_v45 = vadd.f32 %v2664_v42, %v1021_v41  ;;  %v2674_v41 = vld [vmem:[%s3816_s26 + $0x28] sm:$0xff] }
 0x83d   :  { %v1022_v46 = vmul.f32 %v2663_v39, %v1014_v44  ;;  %2901 = vmatprep.mubr.msk.f32.mxu1 %vm70_vm0, %v1029_v45  ;;  %v2675_v44 = vld [vmem:[%s3816_s26 + $0x30] sm:$0xff] }
 0x83f   :  { %v1030_v47 = vadd.f32 %v2664_v42, %v1022_v46  ;;  %v2673_v42 = vld [vmem:[%s3816_s26 + $0x20] sm:$0xff] }
 0x840   :  { %v3077_v43 = vpack.c.bf16 %v2674_v41, %v2673_v42 }
 0x841   :  { %2902 = vmatmul.mubr.msk.f32.vlgmr.msra.gmra.mrb[10].mxu1 %vm70_vm0, %v1030_v47 }
 0x842   :  { %3078 = vmatprep.subr.bf16.mxu1 %v3077_v43 }
 0x843   :  { %3080 = vmatpush3.bf16.msra.mxu1 %v3077_v43 }
 0x914   :  { %v2903_v62 = vpop.f32.mrb[10].mxu1 }
 0x915   :  { %v1120_v63 = vadd.f32 %v2903_v62, %v2665_v61  ;;  %v1114_v1 = vpop.f32.mrb[11].mxu1 }
 0x916   :  { %v1115_v2 = vadd.f32 %v2665_v61, %v1114_v1  ;;  %v2678_v1 = vld [vmem:[%s3788_s5 + $0x1] ss:$0 sm:$0xff]  ;;  %s3820_s5 = smov 64  }
 0x917   :  { %v1126_v3 = vmul.f32 0.044715, %v1120_v63  ;;  %v1124_v18 = vmul.f32 0.5, %v1120_v63 }
 0x918   :  { %v1125_v4 = vmul.f32 0.044715, %v1115_v2  ;;  %v1123_v16 = vmul.f32 0.5, %v1115_v2 }
 0x919   :  { %v1128_v5 = vmul.f32 %v1126_v3, %v1120_v63 }
 0x91a   :  { %v1127_v6 = vmul.f32 %v1125_v4, %v1115_v2 }
 0x91b   :  { %v1130_v7 = vmul.f32 %v1128_v5, %v1120_v63 }
 0x91c   :  { %v1129_v8 = vmul.f32 %v1127_v6, %v1115_v2 }
 0x91d   :  { %v1132_v9 = vadd.f32 %v1130_v7, %v1120_v63 }
 0x91e   :  { %v1131_v10 = vadd.f32 %v1129_v8, %v1115_v2 }
 0x91f   :  { %v1134_v11 = vmul.f32 0.7978846, %v1132_v9 }
 0x920   :  { %v1133_v12 = vmul.f32 0.7978846, %v1131_v10 }
 0x921   :  { %3163 = vtanh.f32 %v1134_v11 }
 0x922   :  { %3165 = vtanh.f32 %v1133_v12 }
 0x92b   :  { %v3164_v13 = vpop.eup %3163 }
 0x92c   :  { %v3166_v14 = vpop.eup %3165  ;;  %v1138_v15 = vadd.f32 1.0, %v3164_v13 }
 0x92d   :  { %v1137_v17 = vadd.f32 1.0, %v3166_v14 }
 0x92e   :  { %v1140_v20 = vmul.f32 %v1138_v15, %v1124_v18 }
 0x92f   :  { %v1139_v19 = vmul.f32 %v1137_v17, %v1123_v16 }
 0x931   :  { %2920 = vmatprep.mubr.msk.f32.mxu0 %vm1156_vm4, %v1139_v19 }
 0x932   :  { %2921 = vmatmul.mubr.msk.f32.vlgmr.msra.gmra.mrb[10].mxu0 %vm1156_vm4, %v1140_v20 }
 0x933   :  { %2946 = vmatprep.mubr.msk.f32.mxu0 %vm3226_vm1, %v3225_v36 }
 0xa05   :  { %v2922_v22 = vpop.f32.mrb[10].mxu0 }
 0xa06   :  { %v1235_v23 = vadd.f32 %v2922_v22, %v2668_v21  ;;  %v1229_v35 = vpop.f32.mrb[11].mxu0 }
 0xa07   :  { %v1230_v33 = vadd.f32 %v2668_v21, %v1229_v35 }
 0xa08   :  { %v1239_v24 = vadd.f32 %v1235_v23, %v1030_v47 }
 0xa09   :  { %v1238_v25 = vadd.f32 %v1230_v33, %v1029_v45  ;;  %v2676_v45 = vld [vmem:[%s3816_s26 + $0x38] sm:$0xff] }
 0xa0a   :  { %v1245_v26 = vsel %vm70_vm0, %v1239_v24, 0.0  ;;  %v3081_v46 = vpack.c.bf16 %v2676_v45, %v2675_v44 }
 0xa0b   :  { %1246 = vadd.xlane.f32.xlu1 %v1245_v26  ;;  %v1242_v27 = vsel %vm70_vm0, %v1238_v25, 0.0 }
 0xa0c   :  { %1243 = vadd.xlane.f32.xlu0 %v1242_v27  ;;  %3082 = vmatprep.subr.bf16.mxu1 %v3081_v46 }
 0xa0d   :  { %3084 = vmatpush3.bf16.msra.mxu1 %v3081_v46 }
 0xa0e   :  { %2934 = vmatprep.subr.mxu1 %v3225_v36 }
 0xa98   :  { %v1247_v28 = vpop.xlane.xlu1 %1246 }
 0xa99   :  { %v1249_v29 = vmul.f32 0.03125, %v1247_v28  ;;  %v1244_v30 = vpop.xlane.xlu0 %1243 }
 0xa9a   :  { %v1248_v31 = vmul.f32 0.03125, %v1244_v30 }
 0xa9b   :  { %v1251_v32 = vsub.f32 %v1239_v24, %v1249_v29 }
 0xa9c   :  { %v1250_v34 = vsub.f32 %v1238_v25, %v1248_v31 }
 0xa9d   :  { %v1253_v37 = vmul.f32 %v1251_v32, %v1251_v32 }
 0xa9e   :  { %v1252_v38 = vmul.f32 %v1250_v34, %v1250_v34 }
 0xa9f   :  { %v1257_v39 = vsel %vm70_vm0, %v1253_v37, 0.0 }
 0xaa0   :  { %1258 = vadd.xlane.f32.xlu1 %v1257_v39  ;;  %v1254_v40 = vsel %vm70_vm0, %v1252_v38, 0.0 }
 0xaa1   :  { %1255 = vadd.xlane.f32.xlu0 %v1254_v40 }
 0xb2d   :  { %v1259_v47 = vpop.xlane.xlu1 %1258 }
 0xb2e   :  { %v1261_v48 = vmul.f32 0.03125, %v1259_v47  ;;  %v1256_v49 = vpop.xlane.xlu0 %1255 }
 0xb2f   :  { %v1260_v50 = vmul.f32 0.03125, %v1256_v49 }
 0xb30   :  { %v1263_v51 = vadd.f32 1e-12, %v1261_v48 }
 0xb31   :  { %v1262_v53 = vadd.f32 1e-12, %v1260_v50 }
 0xb32   :  { %3167 = vrsqrt.f32 %v1263_v51 }
 0xb33   :  { %3169 = vrsqrt.f32 %v1262_v53 }
 0xb3c   :  { %v3168_v54 = vpop.eup %3167 }
 0xb3d   :  { %v3170_v56 = vpop.eup %3169  ;;  %v1267_v57 = vmul.f32 %v3168_v54, %v1251_v32 }
 0xb3e   :  { %v1266_v58 = vmul.f32 %v3170_v56, %v1250_v34 }
 0xb3f   :  { %v1275_v60 = vmul.f32 %v2671_v55, %v1267_v57 }
 0xb40   :  { %v1274_v61 = vmul.f32 %v2671_v55, %v1266_v58 }
 0xb41   :  { %v3567_v63 = vadd.f32 %v2672_v59, %v1275_v60 }
 0xb42   :  { %v3565_v62 = vadd.f32 %v2672_v59, %v1274_v61 }
 0xb44   :  { %2931 = vmatprep.mubr.msk.f32.mxu1 %vm70_vm0, %v3565_v62 }
 0xb45   :  { %2932 = vmatmul.mubr.msk.f32.vlgmr.msra.gmra.mrb[12].mxu1 %vm70_vm0, %v3567_v63 }
 0xb46   :  { %2936 = vmatprep.mubr.msk.f32.mxu1 %vm3226_vm1, %v3225_v36 }
 0xc18   :  { %v2933_v2 = vpop.f32.mrb[12].mxu1 }
 0xc19   :  { %v1369_v3 = vpop.f32.mrb[13].mxu1  ;;  %v3584_v5 = vadd.f32 %v2933_v2, %v2678_v1 }
 0xc1a   :  { %v3578_v4 = vadd.f32 %v2678_v1, %v1369_v3 }
 0xc1c   :  { %1546 = vrot.lane.b32.xlu1 %v3578_v4, %s3227_s27  ;;  %1379 = vrot.lane.b32.xlu0 %v3578_v4, %s3228_s28 }
 0xc20   :  { %1544 = vrot.lane.b32.xlu1 %v3578_v4, %s3229_s4  ;;  %1884 = vrot.lane.b32.xlu0 %v3584_v5, %s3227_s27 }
 0xc24   :  { %1717 = vrot.lane.b32.xlu1 %v3584_v5, %s3228_s28 }
 0xc28   :  { %1882 = vrot.lane.b32.xlu1 %v3584_v5, %s3229_s4 }
 0xc8e   :  { %v1547_v6 = vpop.permute.xlu1 %1546  ;;  %v1380_v7 = vpop.permute.xlu0 %1379 }
 0xc8f   :  { %2935 = vmatpush3.xpose.msk.msra.mxu1 %vm210_vm2, %v1380_v7  ;;  %2945 = vmatpush3.xpose.msk.msra.mxu0 %vm210_vm2, %v1547_v6  ;;  %v2693_v7 = vld [vmem:[%s3789_s6 + $0x20] sm:$0xff] }
 0xc90   :  { %2954 = vmatprep.subr.mxu0 %v3225_v36  ;;  %2939 = vmatprep.subr.mxu1 %v3225_v36 }
 0xc92   :  { %v1545_v8 = vpop.permute.xlu1 %1544  ;;  %2937 = vmatmul.mubr.msk.f32.vlgmr.msra.gmra.mrb[14].mxu1 %vm210_vm2, %v3578_v4  ;;  %v1885_v10 = vpop.permute.xlu0 %1884 }
 0xc93   :  { %2947 = vmatmul.mubr.msk.f32.vlgmr.msra.gmra.mrb[12].mxu0 %vm210_vm2, %v1545_v8  ;;  %2941 = vmatprep.mubr.msk.f32.mxu1 %vm3226_vm1, %v3225_v36  ;;  %v2694_v8 = vld [vmem:[%s3789_s6 + $0x28] sm:$0xff] }
 0xc94   :  { %2956 = vmatprep.mubr.msk.f32.mxu0 %vm3226_vm1, %v3225_v36 }
 0xc96   :  { %v1718_v9 = vpop.permute.xlu1 %1717 }
 0xc97   :  { %2955 = vmatpush3.xpose.msk.msra.mxu0 %vm210_vm2, %v1718_v9  ;;  %v2695_v9 = vld [vmem:[%s3789_s6 + $0x30] sm:$0xff] }
 0xc98   :  { %2964 = vmatprep.subr.mxu0 %v3225_v36 }
 0xc9a   :  { %2957 = vmatmul.mubr.msk.f32.vlgmr.msra.gmra.mrb[14].mxu0 %vm210_vm2, %v3584_v5  ;;  %v1883_v11 = vpop.permute.xlu1 %1882 }
 0xc9b   :  { %2965 = vmatpush3.xpose.msk.msra.mxu0 %vm210_vm2, %v1885_v10  ;;  %2966 = vmatprep.mubr.msk.f32.mxu0 %vm3226_vm1, %v3225_v36  ;;  %v3085_v10 = vpack.c.bf16 %v2694_v8, %v2693_v7  ;;  %v2716_v7 = vld [vmem:[%s3795_s12 + $0x58] sm:$0xff] }
 0xc9d   :  { %3086 = vmatprep.subr.bf16.mxu0 %v3085_v10 }
 0xc9e   :  { %2967 = vmatmul.mubr.msk.f32.vlgmr.msra.gmra.mrb[16].mxu0 %vm210_vm2, %v1883_v11  ;;  %v2696_v11 = vld [vmem:[%s3789_s6 + $0x38] sm:$0xff] }
 0xc9f   :  { %3088 = vmatpush3.bf16.msra.mxu0 %v3085_v10  ;;  %v2718_v10 = vld [vmem:[%s3795_s12 + $0x68] sm:$0xff] }
 0xd65   :  { %v1451_v12 = vpop.f32.mrb[14].mxu1 }
 0xd66   :  { %v1455_v13 = vmul.f32 0.25, %v1451_v12  ;;  %v2938_v14 = vpop.f32.mrb[15].mxu1  ;;  %v1618_v15 = vpop.f32.mrb[12].mxu0  ;;  %v3089_v12 = vpack.c.bf16 %v2696_v11, %v2695_v9  ;;  %v2717_v9 = vld [vmem:[%s3795_s12 + $0x60] sm:$0xff] }
 0xd67   :  { %v1622_v16 = vmul.f32 0.25, %v1618_v15  ;;  %v2948_v17 = vpop.f32.mrb[13].mxu0  ;;  %v3109_v11 = vpack.c.bf16 %v2718_v10, %v2717_v9 }
 0xd68   :  { %v1456_v18 = vadd.f32 %v1455_v13, %v3423_v52  ;;  %3090 = vmatprep.subr.bf16.mxu0 %v3089_v12 }
 0xd69   :  { %v1623_v19 = vadd.f32 %v1622_v16, %v3423_v52  ;;  %3092 = vmatpush3.bf16.msra.mxu0 %v3089_v12  ;;  %v2719_v12 = vld [vmem:[%s3795_s12 + $0x70] sm:$0xff] }
 0xd6a   :  { %v1457_v20 = vsel %vm291_vm3, %v1456_v18, -inf }
 0xd6b   :  { %1458 = vmax.xlane.f32.xlu0 %v1457_v20  ;;  %v1624_v21 = vsel %vm291_vm3, %v1623_v19, -inf }
 0xd6c   :  { %1625 = vmax.xlane.f32.xlu1 %v1624_v21 }
 0xd6d   :  { %v1789_v22 = vpop.f32.mrb[14].mxu0 }
 0xd6e   :  { %v1793_v23 = vmul.f32 0.25, %v1789_v22  ;;  %v2958_v35 = vpop.f32.mrb[15].mxu0 }
 0xd70   :  { %v1794_v33 = vadd.f32 %v1793_v23, %v3429_v0 }
 0xd71   :  { %v1956_v24 = vpop.f32.mrb[16].mxu0 }
 0xd72   :  { %v1960_v25 = vmul.f32 0.25, %v1956_v24  ;;  %v2968_v26 = vpop.f32.mrb[17].mxu0  ;;  %v1795_v27 = vsel %vm291_vm3, %v1794_v33, -inf }
 0xd73   :  { %1796 = vmax.xlane.f32.xlu0 %v1795_v27 }
 0xd74   :  { %v1961_v28 = vadd.f32 %v1960_v25, %v3429_v0 }
 0xd76   :  { %v1962_v52 = vsel %vm291_vm3, %v1961_v28, -inf }
 0xd77   :  { %1963 = vmax.xlane.f32.xlu0 %v1962_v52 }
 0xdf8   :  { %v1459_v29 = vpop.xlane.xlu0 %1458 }
 0xdf9   :  { %v1460_v30 = vsub.f32 %v1456_v18, %v1459_v29  ;;  %v1626_v31 = vpop.xlane.xlu1 %1625 }
 0xdfa   :  { %v1627_v32 = vsub.f32 %v1623_v19, %v1626_v31 }
 0xdfb   :  { %v1461_v34 = vmul.f32 1.442695, %v1460_v30 }
 0xdfc   :  { %v1628_v37 = vmul.f32 1.442695, %v1627_v32 }
 0xdfd   :  { %3171 = vpow2.f32 %v1461_v34 }
 0xdfe   :  { %3173 = vpow2.f32 %v1628_v37 }
 0xe00   :  { %v1797_v38 = vpop.xlane.xlu0 %1796 }
 0xe01   :  { %v1798_v39 = vsub.f32 %v1794_v33, %v1797_v38  ;;  %v2698_v33 = vld [vmem:[%s3790_s7 + $0x1] ss:$0 sm:$0xff] }
 0xe03   :  { %v1799_v40 = vmul.f32 1.442695, %v1798_v39 }
 0xe04   :  { %v1964_v46 = vpop.xlane.xlu0 %1963 }
 0xe05   :  { %3175 = vpow2.f32 %v1799_v40  ;;  %v1965_v47 = vsub.f32 %v1961_v28, %v1964_v46 }
 0xe07   :  { %v3172_v42 = vpop.eup %3171  ;;  %v1966_v48 = vmul.f32 1.442695, %v1965_v47 }
 0xe08   :  { %v3174_v41 = vpop.eup %3173  ;;  %v1463_v43 = vsel %vm291_vm3, %v3172_v42, 0.0 }
 0xe09   :  { %1464 = vadd.xlane.f32.xlu0 %v1463_v43  ;;  %v1630_v0 = vsel %vm291_vm3, %v3174_v41, 0.0  ;;  %3177 = vpow2.f32 %v1966_v48  ;;  %v2706_v43 = vld [vmem:[%s3793_s10 + $0x28] sm:$0xff] }
 0xe0a   :  { %1631 = vadd.xlane.f32.xlu1 %v1630_v0 }
 0xe0f   :  { %v3176_v44 = vpop.eup %3175 }
 0xe10   :  { %v1801_v45 = vsel %vm291_vm3, %v3176_v44, 0.0 }
 0xe11   :  { %1802 = vadd.xlane.f32.xlu0 %v1801_v45  ;;  %v2708_v45 = vld [vmem:[%s3793_s10 + $0x38] sm:$0xff] }
 0xe13   :  { %v3178_v49 = vpop.eup %3177 }
 0xe14   :  { %v1968_v50 = vsel %vm291_vm3, %v3178_v49, 0.0 }
 0xe1b   :  { %1635 = vrot.lane.b32.xlu1 %v3578_v4, %s3230_s21 }
 0xe1f   :  { %1806 = vrot.lane.b32.xlu1 %v3584_v5, %s3820_s5 }
 0xe27   :  { %1468 = vrot.lane.b32.xlu0 %v3578_v4, %s3820_s5 }
 0xe43   :  { %1969 = vadd.xlane.f32.xlu1 %v1968_v50 }
 0xe54   :  { %1973 = vrot.lane.b32.xlu1 %v3584_v5, %s3230_s21 }
 0xe96   :  { %v1465_v51 = vpop.xlane.xlu0 %1464 }
 0xe97   :  { %3179 = vrcp.f32 %v1465_v51  ;;  %v1632_v53 = vpop.xlane.xlu1 %1631 }
 0xe98   :  { %3181 = vrcp.f32 %v1632_v53 }
 0xe9b   :  { %v1636_v57 = vpop.permute.xlu1 %1635 }
 0xe9e   :  { %v1803_v54 = vpop.xlane.xlu0 %1802 }
 0xe9f   :  { %3183 = vrcp.f32 %v1803_v54  ;;  %v1807_v61 = vpop.permute.xlu1 %1806 }
 0xea1   :  { %v3180_v55 = vpop.eup %3179 }
 0xea2   :  { %v1467_v56 = vmul.f32 %v3180_v55, %v3172_v42  ;;  %v1469_v58 = vpop.permute.xlu0 %1468  ;;  %v3182_v59 = vpop.eup %3181  ;;  %v2703_v55 = vld [vmem:[%s3791_s8 + $0x1] ss:$0 sm:$0xff] }
 0xea3   :  { %2940 = vmatpush3.msra.mxu1 %v1469_v58  ;;  %v1634_v60 = vmul.f32 %v3182_v59, %v3174_v41 }
 0xea4   :  { %2942 = vmatmul.mubr.msk.f32.vlgmr.msra.gmra.mrb[16].mxu1 %vm291_vm3, %v1467_v56  ;;  %2949 = vmatprep.subr.mxu1 %v3225_v36 }
 0xea5   :  { %2950 = vmatpush3.msra.mxu1 %v1636_v57  ;;  %2951 = vmatprep.mubr.msk.f32.mxu1 %vm3226_vm1, %v3225_v36  ;;  %v2704_v57 = vld [vmem:[%s3792_s9 + $0x1] ss:$0 sm:$0xff] }
 0xea6   :  { %2959 = vmatprep.subr.mxu1 %v3225_v36 }
 0xea8   :  { %2952 = vmatmul.mubr.msk.f32.vlgmr.msra.gmra.mrb[18].mxu1 %vm291_vm3, %v1634_v60 }
 0xea9   :  { %v3184_v1 = vpop.eup %3183  ;;  %2960 = vmatpush3.msra.mxu1 %v1807_v61  ;;  %2961 = vmatprep.mubr.msk.f32.mxu1 %vm3226_vm1, %v3225_v36 }
 0xeaa   :  { %v1805_v2 = vmul.f32 %v3184_v1, %v3176_v44  ;;  %2969 = vmatprep.subr.mxu1 %v3225_v36  ;;  %v2707_v44 = vld [vmem:[%s3793_s10 + $0x30] sm:$0xff] }
 0xeab   :  { %v3097_v46 = vpack.c.bf16 %v2708_v45, %v2707_v44 }
 0xeac   :  { %2962 = vmatmul.mubr.msk.f32.vlgmr.msra.gmra.mrb[20].mxu1 %vm291_vm3, %v1805_v2 }
 0xead   :  { %2971 = vmatprep.mubr.msk.f32.mxu1 %vm3226_vm1, %v3225_v36 }
 0xed0   :  { %v1970_v3 = vpop.xlane.xlu1 %1969 }
 0xed1   :  { %3185 = vrcp.f32 %v1970_v3  ;;  %v2713_v3 = vld [vmem:[%s3795_s12 + $0x40] sm:$0xff] }
 0xed4   :  { %v1974_v4 = vpop.permute.xlu1 %1973 }
 0xed5   :  { %2970 = vmatpush3.msra.mxu1 %v1974_v4  ;;  %v2714_v4 = vld [vmem:[%s3795_s12 + $0x48] sm:$0xff] }
 0xedb   :  { %v3186_v5 = vpop.eup %3185 }
 0xedc   :  { %v1972_v6 = vmul.f32 %v3186_v5, %v3178_v49  ;;  %v3101_v5 = vpack.c.bf16 %v2714_v4, %v2713_v3 }
 0xede   :  { %2972 = vmatmul.mubr.msk.f32.vlgmr.msra.gmra.mrb[22].mxu1 %vm291_vm3, %v1972_v6  ;;  %v2715_v6 = vld [vmem:[%s3795_s12 + $0x50] sm:$0xff]  ;;  %3102 = vmatprep.subr.bf16.mxu0 %v3101_v5 }
 0xedf   :  { %v3105_v8 = vpack.c.bf16 %v2716_v7, %v2715_v6 }
 0xf77   :  { %v1540_v13 = vpop.f32.mrb[16].mxu1 }
 0xf78   :  { %v2943_v14 = vpop.f32.mrb[17].mxu1 }
 0xf7b   :  { %v1707_v15 = vpop.f32.mrb[18].mxu1 }
 0xf7c   :  { %1712 = vrot.lane.b32.xlu0 %v1707_v15, %s3821_s0  ;;  %v2953_v16 = vpop.f32.mrb[19].mxu1  ;;  %v2710_v15 = vld [vmem:[%s3794_s11 + $0x1] ss:$0 sm:$0xff] }
 0xf7f   :  { %v1878_v17 = vpop.f32.mrb[20].mxu1 }
 0xf80   :  { %v2963_v18 = vpop.f32.mrb[21].mxu1 }
 0xfb1   :  { %v2045_v19 = vpop.f32.mrb[22].mxu1 }
 0xfb2   :  { %2050 = vrot.lane.b32.xlu1 %v2045_v19, %s3821_s0  ;;  %v2973_v20 = vpop.f32.mrb[23].mxu1 }
 0xfee   :  { %v1713_v21 = vpop.permute.xlu0 %1712 }
 0xfef   :  { %v1715_v22 = vsel %vm210_vm2, %v1540_v13, %v1713_v21  ;;  %v2720_v13 = vld [vmem:[%s3795_s12 + $0x78] sm:$0xff] }
 0xff0   :  { %2982 = vmatprep.mubr.msk.f32.mxu0 %vm70_vm0, %v1715_v22  ;;  %v3113_v14 = vpack.c.bf16 %v2720_v13, %v2719_v12  ;;  %v2728_v12 = vld [vmem:[%s3798_s15 + $0x1] ss:$0 sm:$0xff] }
0x1024   :  { %v2051_v23 = vpop.permute.xlu1 %2050 }
0x1025   :  { %v2053_v35 = vsel %vm210_vm2, %v1878_v17, %v2051_v23 }
0x1026   :  { %2983 = vmatmul.mubr.msk.f32.vlgmr.msra.gmra.mrb[18].mxu0 %vm70_vm0, %v2053_v35 }
0x1027   :  { %3104 = vmatpush3.bf16.msra.mxu0 %v3101_v5 }
0x1028   :  { %3106 = vmatprep.subr.bf16.mxu0 %v3105_v8 }
0x102b   :  { %3108 = vmatpush3.bf16.msra.mxu0 %v3105_v8  ;;  %v2727_v8 = vld [vmem:[%s3797_s14 + $0x1] ss:$0 sm:$0xff] }
0x102c   :  { %3110 = vmatprep.subr.bf16.mxu0 %v3109_v11 }
0x102f   :  { %3112 = vmatpush3.bf16.msra.mxu0 %v3109_v11 }
0x1030   :  { %3114 = vmatprep.subr.bf16.mxu0 %v3113_v14 }
0x1033   :  { %3116 = vmatpush3.bf16.msra.mxu0 %v3113_v14 }
0x10f9   :  { %v2984_v24 = vpop.f32.mrb[18].mxu0 }
0x10fa   :  { %v2145_v25 = vadd.f32 %v2984_v24, %v2698_v33  ;;  %v2139_v26 = vpop.f32.mrb[19].mxu0 }
0x10fb   :  { %v2140_v27 = vadd.f32 %v2698_v33, %v2139_v26 }
0x10fc   :  { %v2149_v28 = vadd.f32 %v2145_v25, %v3567_v63 }
0x10fd   :  { %v2148_v52 = vadd.f32 %v2140_v27, %v3565_v62  ;;  %v2705_v62 = vld [vmem:[%s3793_s10 + $0x20] sm:$0xff] }
0x10fe   :  { %v2157_v29 = vsel %vm70_vm0, %v2149_v28, 0.0  ;;  %v3093_v0 = vpack.c.bf16 %v2706_v43, %v2705_v62 }
0x10ff   :  { %2158 = vadd.xlane.f32.xlu1 %v2157_v29  ;;  %v2154_v30 = vsel %vm70_vm0, %v2148_v52, 0.0 }
0x1100   :  { %2155 = vadd.xlane.f32.xlu0 %v2154_v30  ;;  %3094 = vmatprep.subr.bf16.mxu1 %v3093_v0 }
0x1101   :  { %3096 = vmatpush3.bf16.msra.mxu1 %v3093_v0 }
0x1102   :  { %3098 = vmatprep.subr.bf16.mxu1 %v3097_v46 }
0x1105   :  { %3100 = vmatpush3.bf16.msra.mxu1 %v3097_v46 }
0x118c   :  { %v2159_v31 = vpop.xlane.xlu1 %2158 }
0x118d   :  { %v2161_v32 = vmul.f32 0.03125, %v2159_v31  ;;  %v2156_v34 = vpop.xlane.xlu0 %2155 }
0x118e   :  { %v2160_v37 = vmul.f32 0.03125, %v2156_v34 }
0x118f   :  { %v2163_v38 = vsub.f32 %v2149_v28, %v2161_v32 }
0x1190   :  { %v2162_v39 = vsub.f32 %v2148_v52, %v2160_v37 }
0x1191   :  { %v2165_v41 = vmul.f32 %v2163_v38, %v2163_v38 }
0x1192   :  { %v2164_v40 = vmul.f32 %v2162_v39, %v2162_v39 }
0x1193   :  { %v2169_v63 = vsel %vm70_vm0, %v2165_v41, 0.0 }
0x1194   :  { %v2166_v42 = vsel %vm70_vm0, %v2164_v40, 0.0 }
0x1195   :  { %2167 = vadd.xlane.f32.xlu0 %v2166_v42 }
0x1199   :  { %2170 = vadd.xlane.f32.xlu0 %v2169_v63 }
0x1222   :  { %v2168_v47 = vpop.xlane.xlu0 %2167 }
0x1223   :  { %v2172_v48 = vmul.f32 0.03125, %v2168_v47 }
0x1225   :  { %v2174_v49 = vadd.f32 1e-12, %v2172_v48 }
0x1226   :  { %v2171_v50 = vpop.xlane.xlu0 %2170 }
0x1227   :  { %3187 = vrsqrt.f32 %v2174_v49  ;;  %v2173_v51 = vmul.f32 0.03125, %v2171_v50 }
0x1229   :  { %v2175_v53 = vadd.f32 1e-12, %v2173_v51 }
0x122b   :  { %3189 = vrsqrt.f32 %v2175_v53 }
0x1231   :  { %v3188_v54 = vpop.eup %3187 }
0x1232   :  { %v2178_v56 = vmul.f32 %v3188_v54, %v2162_v39 }
0x1234   :  { %v2186_v58 = vmul.f32 %v2703_v55, %v2178_v56  ;;  %v2460_v56 = vld [vmem:[%s3799_s16 + $0x8] sm:$0xff] }
0x1235   :  { %v3190_v59 = vpop.eup %3189 }
0x1236   :  { %v2179_v60 = vmul.f32 %v3190_v59, %v2163_v38  ;;  %v2194_v61 = vadd.f32 %v2704_v57, %v2186_v58  ;;  %v2722_v38 = vld [vmem:[%s3796_s13 + $0x1] ss:$0 sm:$0xff]  ;;  %v2461_v58 = vld [vmem:[%s3799_s16 + $0x10] sm:$0xff]  ;;  %v2462_v59 = vld [vmem:[%s3799_s16 + $0x18] sm:$0xff] }
0x1238   :  { %v2187_v1 = vmul.f32 %v2703_v55, %v2179_v60  ;;  %2993 = vmatprep.mubr.msk.f32.mxu1 %vm70_vm0, %v2194_v61  ;;  %v2459_v55 = vld [vmem:[%s3799_s16] sm:$0xff]  ;;  %v3233_v60 = vmov 0.0|0.0  }
0x1239   :  { %3117 = vmatprep.subr.bf16.mxu1 %v3233_v60 }
0x123a   :  { %v2195_v2 = vadd.f32 %v2704_v57, %v2187_v1  ;;  %v3118_v57 = vpack.c.bf16 %v2460_v56, %v2459_v55 }
0x123c   :  { %2994 = vmatmul.mubr.msk.f32.vlgmr.msra.gmra.mrb[24].mxu1 %vm70_vm0, %v2195_v2 }
0x123d   :  { %3023 = vmatprep.mubr.msk.f32.mxu1 %vm3226_vm1, %v3225_v36  ;;  %3119 = vmatpush3.bf16.msra.mxu1 %v3118_v57 }
0x123e   :  { %3120 = vmatprep.subr.bf16.mxu1 %v3233_v60 }
0x130f   :  { %v2995_v16 = vpop.f32.mrb[24].mxu1 }
0x1310   :  { %v2287_v17 = vadd.f32 %v2995_v16, %v2710_v15  ;;  %v2281_v18 = vpop.f32.mrb[25].mxu1 }
0x1311   :  { %v2282_v19 = vadd.f32 %v2710_v15, %v2281_v18 }
0x1312   :  { %v2293_v20 = vmul.f32 0.044715, %v2287_v17  ;;  %v2291_v32 = vmul.f32 0.5, %v2287_v17 }
0x1313   :  { %v2292_v21 = vmul.f32 0.044715, %v2282_v19  ;;  %v2290_v30 = vmul.f32 0.5, %v2282_v19 }
0x1314   :  { %v2295_v22 = vmul.f32 %v2293_v20, %v2287_v17  ;;  %v2545_v20 = vld [vmem:[%s3801_s18 + $0x8] sm:$0xff] }
0x1315   :  { %v2294_v23 = vmul.f32 %v2292_v21, %v2282_v19  ;;  %v2546_v21 = vld [vmem:[%s3801_s18 + $0x10] sm:$0xff] }
0x1316   :  { %v2297_v35 = vmul.f32 %v2295_v22, %v2287_v17 }
0x1317   :  { %v2296_v33 = vmul.f32 %v2294_v23, %v2282_v19  ;;  %v2547_v23 = vld [vmem:[%s3801_s18 + $0x18] sm:$0xff] }
0x1318   :  { %v2299_v24 = vadd.f32 %v2297_v35, %v2287_v17  ;;  %v3127_v35 = vpack.c.bf16 %v2547_v23, %v2546_v21 }
0x1319   :  { %v2298_v25 = vadd.f32 %v2296_v33, %v2282_v19  ;;  %v2544_v19 = vld [vmem:[%s3801_s18] sm:$0xff]  ;;  %s3234_s18 = smov [#allocation2]  }
0x131a   :  { %v2301_v26 = vmul.f32 0.7978846, %v2299_v24  ;;  %v3124_v22 = vpack.c.bf16 %v2545_v20, %v2544_v19  ;;  %s2635_s28 = sshll.u32 %s3234_s18, 4  ;;  %s2636_s28 = int_to_ptr.vmem [resolvable:$true] %s2635_s28 }
0x131b   :  { %v2300_v27 = vmul.f32 0.7978846, %v2298_v25  ;;  %s3201_s11 = scalar_lea.vmem %s2636_s28, 32  ;;  %p3206_p1 = scmp.lt.s32.totalorder %s2636_s28, %s2636_s28 }
0x131c   :  { %3191 = vtanh.f32 %v2301_v26  ;;  %p3202_p0 = scmp.ne.s32.totalorder %s2636_s28, %s3201_s11  ;;  %p3207_p2 = scmp.lt.s32.totalorder %s3201_s11, %s3201_s11 }
0x131d   :  { %3193 = vtanh.f32 %v2300_v27  ;;  %v2731_v27 = vld [vmem:[%s3802_s19] ss:$0 sm:$0xff] }
0x131e   :  { %p3208_p3 = por %p3207_p2, %p3206_p1 }
0x1320   :  { %p3209_p4 = pnand %p3208_p3, %p3202_p0 }
0x1326   :  { %v3192_v28 = vpop.eup %3191 }
0x1327   :  { %v3194_v52 = vpop.eup %3193  ;;  %v2305_v29 = vadd.f32 1.0, %v3192_v28 }
0x1328   :  { %v2304_v31 = vadd.f32 1.0, %v3194_v52 }
0x1329   :  { %v2307_v37 = vmul.f32 %v2305_v29, %v2291_v32 }
0x132a   :  { %v2306_v34 = vmul.f32 %v2304_v31, %v2290_v30 }
0x132c   :  { %3012 = vmatprep.mubr.msk.f32.mxu0 %vm1156_vm4, %v2306_v34 }
0x132d   :  { %3013 = vmatmul.mubr.msk.f32.vlgmr.msra.gmra.mrb[20].mxu0 %vm1156_vm4, %v2307_v37 }
0x1400   :  { %v3014_v39 = vpop.f32.mrb[20].mxu0 }
0x1401   :  { %v2403_v40 = vadd.f32 %v3014_v39, %v2722_v38  ;;  %v2397_v42 = vpop.f32.mrb[21].mxu0 }
0x1402   :  { %v2398_v41 = vadd.f32 %v2722_v38, %v2397_v42 }
0x1403   :  { %v2407_v63 = vadd.f32 %v2403_v40, %v2195_v2 }
0x1404   :  { %v2406_v62 = vadd.f32 %v2398_v41, %v2194_v61  ;;  %v3121_v61 = vpack.c.bf16 %v2462_v59, %v2461_v58 }
0x1405   :  { %v2415_v43 = vsel %vm70_vm0, %v2407_v63, 0.0 }
0x1406   :  { %2416 = vadd.xlane.f32.xlu0 %v2415_v43  ;;  %v2412_v0 = vsel %vm70_vm0, %v2406_v62, 0.0  ;;  %3122 = vmatpush3.bf16.msra.mxu1 %v3121_v61 }
0x1407   :  { %2413 = vadd.xlane.f32.xlu1 %v2412_v0  ;;  %3123 = vmatprep.subr.bf16.mxu1 %v3233_v60 }
0x1493   :  { %v2417_v44 = vpop.xlane.xlu0 %2416 }
0x1494   :  { %v2419_v45 = vmul.f32 0.03125, %v2417_v44  ;;  %v2414_v46 = vpop.xlane.xlu1 %2413 }
0x1495   :  { %v2418_v47 = vmul.f32 0.03125, %v2414_v46 }
0x1496   :  { %v2421_v48 = vsub.f32 %v2407_v63, %v2419_v45 }
0x1497   :  { %v2420_v49 = vsub.f32 %v2406_v62, %v2418_v47 }
0x1498   :  { %v2423_v50 = vmul.f32 %v2421_v48, %v2421_v48 }
0x1499   :  { %v2422_v51 = vmul.f32 %v2420_v49, %v2420_v49 }
0x149a   :  { %v2427_v53 = vsel %vm70_vm0, %v2423_v50, 0.0 }
0x149b   :  { %2428 = vadd.xlane.f32.xlu0 %v2427_v53  ;;  %v2424_v54 = vsel %vm70_vm0, %v2422_v51, 0.0 }
0x149c   :  { %2425 = vadd.xlane.f32.xlu1 %v2424_v54 }
0x1528   :  { %v2429_v1 = vpop.xlane.xlu0 %2428 }
0x1529   :  { %v2431_v2 = vmul.f32 0.03125, %v2429_v1  ;;  %v2426_v3 = vpop.xlane.xlu1 %2425 }
0x152a   :  { %v2430_v4 = vmul.f32 0.03125, %v2426_v3 }
0x152b   :  { %v2433_v5 = vadd.f32 1e-12, %v2431_v2 }
0x152c   :  { %v2432_v6 = vadd.f32 1e-12, %v2430_v4 }
0x152d   :  { %3195 = vrsqrt.f32 %v2433_v5 }
0x152e   :  { %3197 = vrsqrt.f32 %v2432_v6 }
0x1537   :  { %v3196_v7 = vpop.eup %3195 }
0x1538   :  { %v3198_v9 = vpop.eup %3197  ;;  %v2437_v10 = vmul.f32 %v3196_v7, %v2421_v48 }
0x1539   :  { %v2436_v11 = vmul.f32 %v3198_v9, %v2420_v49 }
0x153a   :  { %v2445_v13 = vmul.f32 %v2727_v8, %v2437_v10 }
0x153b   :  { %v2444_v14 = vmul.f32 %v2727_v8, %v2436_v11 }
0x153c   :  { %v2453_v15 = vadd.f32 %v2728_v12, %v2445_v13 }
0x153d   :  { %v2452_v16 = vadd.f32 %v2728_v12, %v2444_v14 }
0x153e   :  { %v2455_v17 = vrot.slane %v2453_v15, 7 }
0x1540   :  { %v2458_v18 = vsel %vm2457_vm5, %v2452_v16, %v2455_v17 }
0x1541   :  { %3024 = vmatmul.mubr.msk.f32.vlgmr.msra.gmra.mrb[26].mxu1 %vm70_vm0, %v2458_v18 }
0x1542   :  { %3034 = vmatprep.mubr.msk.f32.mxu1 %vm3226_vm1, %v3225_v36  ;;  %3125 = vmatpush3.bf16.msra.mxu1 %v3124_v22  ;;  %v2729_v36 = vld [vmem:[%s3800_s17] ss:$0 sm:$0xff] }
0x1543   :  { %3126 = vmatprep.subr.bf16.mxu1 %v3233_v60 }
0x1546   :  { %3128 = vmatpush3.bf16.msra.mxu1 %v3127_v35 }
0x1614   :  { %v2539_v33 = vpop.f32.mrb[26].mxu1 }
0x1615   :  { %v2540_v24 = vadd.f32 %v2729_v36, %v2539_v33  ;;  %v3025_v25 = vpop.f32.mrb[27].mxu1 }
0x1617   :  { %3199 = vtanh.f32 %v2540_v24 }
0x1621   :  { %v3200_v26 = vpop.eup %3199 }
0x1622   :  { %3035 = vmatmul.mubr.msk.f32.vlgmr.msra.gmra.mrb[28].mxu1 %vm70_vm0, %v3200_v26 }
0x16f5   :  { %v2624_v28 = vpop.f32.mrb[28].mxu1 }
0x16f6   :  { %v2625_v52 = vadd.f32 %v2731_v27, %v2624_v28  ;;  %v3036_v29 = vpop.f32.mrb[29].mxu1 }
0x16f8   :  { %2628 = vst [vmem:[#allocation2] sm:$0x3] %v2625_v52 }
0x16f9   :  { %3212 = shalt.err (!%p3209_p4)
}
0x16fa   :  { %s3213_s13 = scalar_lea.hbm %s3803_s20, 32 }
0x16fb   :  { %p3214_p5 = scmp.ne.s32.totalorder %s3803_s20, %s3213_s13  ;;  %p3217_p6 = scmp.lt.u32.totalorder %s3213_s13, %s3803_s20 }
0x16fd   :  { %p3219_p7 = pnand %p3217_p6, %p3214_p5 }
0x16ff   :  { %3222 = shalt.err (!%p3219_p7)
}
0x1700   :  { %2638 = dma.vmem_to_hbm [thread:$0]  %s2636_s28, 32, %s3803_s20, [#allocation3]  }
0x1701   :  { %3223 = dma.done.wait [#allocation3], 32  }
0x1702   :  { %3224 = vsyncadd [#allocation3], 4294967264 }
0x1703   :  { %2642 = vsyncpa [#allocation3], 1 }

</bundles_post_ra>
